<compile_context>
chip_gen: v6e
topology: v6e:2x2x1
jax: 0.10.0
libtpu: 0.0.40
codegen_flags: <defaults>
</compile_context>

<pallas_src>
import jax
import jax.numpy as jnp
from jax import lax
from jax.experimental import pallas as pl
from jax.experimental.pallas import tpu as pltpu

H = 64            # hidden / embedding size
VOCAB = 100
N_LABELS = 3      # per head
N_HEADS = 3       # aspect / opinion / sentiment
HEAD_PAD = 128    # lane-dense padded width of the fused head output


def _lstm_pool_heads_kernel(idx_ref, gx_tbl_ref, whh_ref, whead_ref, bhead_ref,
                            out_ref):
    """idx_ref:    (T,) int32, scalar-prefetched character indices (SMEM).
    gx_tbl_ref: (VOCAB, 4H) precomputed  E @ W_ih^T + (b_ih + b_hh)  (VMEM).
    whh_ref:    (H, 4H) recurrent weight (VMEM).
    whead_ref:  (H, 128) fused, zero-padded head weights (VMEM).
    bhead_ref:  (1, 128) fused, zero-padded head bias (VMEM).
    out_ref:    (1, 128) padded fused head logits (VMEM)."""
    seq_len = idx_ref.shape[0]

    # Recurrent weight loaded once (~16 vregs), reused by every unrolled step.
    whh = whh_ref[...]                                      # (H, 4H)

    def step(t, carry):
        h, c, acc = carry                                   # each (1, H)
        # In-kernel gather of the precomputed input projection for token t.
        gx_t = gx_tbl_ref[pl.ds(idx_ref[t], 1), :]          # (1, 4H)
        gates = gx_t + jnp.dot(h, whh, preferred_element_type=jnp.float32)
        # Gate order is i, f, g, o.  Sigmoid over the full 256 lanes (3/4 of
        # it is used); tanh only on the g-gate slice (EUP FIFO feeds the
        # serial chain via tanh(c_new)).
        sig = jax.nn.sigmoid(gates)
        i_g = sig[:, 0 * H:1 * H]
        f_g = sig[:, 1 * H:2 * H]
        o_g = sig[:, 3 * H:4 * H]
        g_g = jnp.tanh(gates[:, 2 * H:3 * H])
        c_new = f_g * c + i_g * g_g
        h_new = o_g * jnp.tanh(c_new)
        return (h_new, c_new, acc + h_new)

    zeros = jnp.zeros((1, H), jnp.float32)
    _, _, h_sum = lax.fori_loop(0, seq_len, step, (zeros, zeros, zeros),
                                unroll=True)                # T is static -> full unroll
    pooled = h_sum * (1.0 / seq_len)                        # mean over time, (1, H)

    # Fused, zero-padded head matmul -> lane-dense (1, 128) unmasked store.
    out_ref[...] = (jnp.dot(pooled, whead_ref[...],
                            preferred_element_type=jnp.float32)
                    + bhead_ref[...])


def prepare_params(params):
    """One-time weight re-arrangement; NOT part of the per-call hot path."""
    bias = (params["b_ih"] + params["b_hh"]).reshape(1, 4 * H)          # (1, 256)
    # Folded embedding + input projection + bias (exact algebraic identity).
    gx_table = params["embedding"] @ params["w_ih"].T + bias            # (100, 256)
    whh_t = params["w_hh"].T                                            # (64, 256)
    w_heads = jnp.concatenate(
        [params["w_aspect"].T, params["w_opinion"].T, params["w_sentiment"].T],
        axis=1)                                                         # (64, 9)
    b_heads = jnp.concatenate(
        [params["b_aspect"], params["b_opinion"], params["b_sentiment"]],
        axis=0).reshape(1, N_HEADS * N_LABELS)                          # (1, 9)
    # Zero-pad the fused heads to 128 lanes -> unmasked store in the kernel.
    pad = HEAD_PAD - N_HEADS * N_LABELS
    w_heads = jnp.pad(w_heads, ((0, 0), (0, pad)))                      # (64, 128)
    b_heads = jnp.pad(b_heads, ((0, 0), (0, pad)))                      # (1, 128)
    return {
        "gx_table": gx_table.astype(jnp.float32),
        "w_hh_t": whh_t.astype(jnp.float32),
        "w_heads": w_heads.astype(jnp.float32),
        "b_heads": b_heads.astype(jnp.float32),
    }


def aste_forward(indices, fused_params):
    """indices: int32 (T,).  Returns dict of (1, 3) float32 logits."""
    fused = pl.pallas_call(
        _lstm_pool_heads_kernel,
        out_shape=jax.ShapeDtypeStruct((1, HEAD_PAD), jnp.float32),
        grid_spec=pltpu.PrefetchScalarGridSpec(
            num_scalar_prefetch=1,                 # indices -> SMEM before the grid
            grid=(1,),
            in_specs=[
                pl.BlockSpec(memory_space=pltpu.MemorySpace.VMEM),  # gx_table (100,256)
                pl.BlockSpec(memory_space=pltpu.MemorySpace.VMEM),  # W_hh^T   (64,256)
                pl.BlockSpec(memory_space=pltpu.MemorySpace.VMEM),  # heads W  (64,128)
                pl.BlockSpec(memory_space=pltpu.MemorySpace.VMEM),  # heads b  (1,128)
            ],
            out_specs=pl.BlockSpec(memory_space=pltpu.MemorySpace.VMEM),
        ),
    )(indices, fused_params["gx_table"], fused_params["w_hh_t"],
      fused_params["w_heads"], fused_params["b_heads"])

    return {
        "aspects": fused[:, 0:3],
        "opinions": fused[:, 3:6],
        "sentiments": fused[:, 6:9],
    }


def init_params(key):
    ks = jax.random.split(key, 8)
    scale = 0.1
    return {
        "embedding":   scale * jax.random.normal(ks[0], (VOCAB, H), jnp.float32),
        "w_ih":        scale * jax.random.normal(ks[1], (4 * H, H), jnp.float32),
        "w_hh":        scale * jax.random.normal(ks[2], (4 * H, H), jnp.float32),
        "b_ih":        scale * jax.random.normal(ks[3], (4 * H,), jnp.float32),
        "b_hh":        scale * jax.random.normal(ks[4], (4 * H,), jnp.float32),
        "w_aspect":    scale * jax.random.normal(ks[5], (N_LABELS, H), jnp.float32),
        "b_aspect":    jnp.zeros((N_LABELS,), jnp.float32),
        "w_opinion":   scale * jax.random.normal(ks[6], (N_LABELS, H), jnp.float32),
        "b_opinion":   jnp.zeros((N_LABELS,), jnp.float32),
        "w_sentiment": scale * jax.random.normal(ks[7], (N_LABELS, H), jnp.float32),
        "b_sentiment": jnp.zeros((N_LABELS,), jnp.float32),
    }


if __name__ == "__main__":
    key = jax.random.PRNGKey(0)
    params = init_params(key)
    fused_params = prepare_params(params)      # one-time prep, outside the jit call

    text = "great pizza here"                  # 16-char synthetic input (T=16)
    indices = jnp.array([ord(c) % VOCAB for c in text], dtype=jnp.int32)  # (16,)

    out = jax.jit(aste_forward)(indices, fused_params)
    out = jax.tree_util.tree_map(jax.block_until_ready, out)

    assert out["aspects"].shape == (1, 3)
    assert out["opinions"].shape == (1, 3)
    assert out["sentiments"].shape == (1, 3)
    assert all(bool(jnp.all(jnp.isfinite(v))) for v in out.values())
    print("KERNEL_OK")
</pallas_src>

<mosaic_0001>
module attributes {stable_mosaic.version = 11 : i64} {
  func.func @_lstm_pool_heads_kernel(%arg0: i32, %arg1: memref<16xi32, #tpu.memory_space<smem>>, %arg2: memref<100x256xf32, #tpu.memory_space<vmem>>, %arg3: memref<64x256xf32, #tpu.memory_space<vmem>>, %arg4: memref<64x128xf32, #tpu.memory_space<vmem>>, %arg5: memref<1x128xf32, #tpu.memory_space<vmem>>, %arg6: memref<1x128xf32, #tpu.memory_space<vmem>>) attributes {dimension_semantics = [#tpu.dimension_semantics<arbitrary>], iteration_bounds = array<i64: 1>, scalar_prefetch = 1 : i64, scratch_operands = 0 : i64, tpu.core_type = #tpu.core_type<tc>, window_params = [{pipeline_mode = #tpu.pipeline_mode<synchronous>, transform_indices = @transform_0, window_bounds = array<i64: 100, 256>}, {pipeline_mode = #tpu.pipeline_mode<synchronous>, transform_indices = @transform_1, window_bounds = array<i64: 64, 256>}, {pipeline_mode = #tpu.pipeline_mode<synchronous>, transform_indices = @transform_2, window_bounds = array<i64: 64, 128>}, {pipeline_mode = #tpu.pipeline_mode<synchronous>, transform_indices = @transform_3, window_bounds = array<i64: 1, 128>}, {pipeline_mode = #tpu.pipeline_mode<synchronous>, transform_indices = @transform_4, window_bounds = array<i64: 1, 128>}]} {
    %c0 = arith.constant 0 : index
    %c0_0 = arith.constant 0 : index
    %0 = vector.load %arg3[%c0, %c0_0] : memref<64x256xf32, #tpu.memory_space<vmem>>, vector<64x256xf32>
    %cst = arith.constant 0.000000e+00 : f32
    %1 = vector.broadcast %cst : f32 to vector<1x64xf32>
    %c0_i32 = arith.constant 0 : i32
    %2 = arith.index_cast %c0_i32 : i32 to index
    %3 = memref.load %arg1[%2] : memref<16xi32, #tpu.memory_space<smem>>
    %4 = arith.index_cast %3 : i32 to index
    %c0_1 = arith.constant 0 : index
    %5 = vector.load %arg2[%4, %c0_1] : memref<100x256xf32, #tpu.memory_space<vmem>>, vector<1x256xf32>
    %cst_2 = arith.constant dense<0.000000e+00> : vector<1x256xf32>
    %6 = tpu.matmul %1, %0, %cst_2 {dimension_numbers = #tpu.dot_dimension_numbers<[1], [0], [0], [1], [0, 0, 1, 1], [], []>} : vector<1x64xf32>, vector<64x256xf32>, vector<1x256xf32> -> vector<1x256xf32>
    %7 = arith.addf %5, %6 : vector<1x256xf32>
    %8 = arith.negf %7 : vector<1x256xf32>
    %9 = math.exp %8 : vector<1x256xf32>
    %cst_3 = arith.constant 1.000000e+00 : f32
    %10 = vector.broadcast %cst_3 : f32 to vector<1x256xf32>
    %11 = arith.addf %10, %9 : vector<1x256xf32>
    %12 = arith.divf %10, %11 : vector<1x256xf32>
    %13 = vector.extract_strided_slice %12 {offsets = [0, 0], sizes = [1, 64], strides = [1, 1]} : vector<1x256xf32> to vector<1x64xf32>
    %14 = vector.extract_strided_slice %12 {offsets = [0, 64], sizes = [1, 64], strides = [1, 1]} : vector<1x256xf32> to vector<1x64xf32>
    %15 = vector.extract_strided_slice %12 {offsets = [0, 192], sizes = [1, 64], strides = [1, 1]} : vector<1x256xf32> to vector<1x64xf32>
    %16 = vector.extract_strided_slice %7 {offsets = [0, 128], sizes = [1, 64], strides = [1, 1]} : vector<1x256xf32> to vector<1x64xf32>
    %17 = math.tanh %16 : vector<1x64xf32>
    %18 = arith.mulf %14, %1 : vector<1x64xf32>
    %19 = arith.mulf %13, %17 : vector<1x64xf32>
    %20 = arith.addf %18, %19 : vector<1x64xf32>
    %21 = math.tanh %20 : vector<1x64xf32>
    %22 = arith.mulf %15, %21 : vector<1x64xf32>
    %23 = arith.addf %1, %22 : vector<1x64xf32>
    %c1_i32 = arith.constant 1 : i32
    %24 = arith.index_cast %c1_i32 : i32 to index
    %25 = memref.load %arg1[%24] : memref<16xi32, #tpu.memory_space<smem>>
    %26 = arith.index_cast %25 : i32 to index
    %c0_4 = arith.constant 0 : index
    %27 = vector.load %arg2[%26, %c0_4] : memref<100x256xf32, #tpu.memory_space<vmem>>, vector<1x256xf32>
    %cst_5 = arith.constant dense<0.000000e+00> : vector<1x256xf32>
    %28 = tpu.matmul %22, %0, %cst_5 {dimension_numbers = #tpu.dot_dimension_numbers<[1], [0], [0], [1], [0, 0, 1, 1], [], []>} : vector<1x64xf32>, vector<64x256xf32>, vector<1x256xf32> -> vector<1x256xf32>
    %29 = arith.addf %27, %28 : vector<1x256xf32>
    %30 = arith.negf %29 : vector<1x256xf32>
    %31 = math.exp %30 : vector<1x256xf32>
    %cst_6 = arith.constant 1.000000e+00 : f32
    %32 = vector.broadcast %cst_6 : f32 to vector<1x256xf32>
    %33 = arith.addf %32, %31 : vector<1x256xf32>
    %34 = arith.divf %32, %33 : vector<1x256xf32>
    %35 = vector.extract_strided_slice %34 {offsets = [0, 0], sizes = [1, 64], strides = [1, 1]} : vector<1x256xf32> to vector<1x64xf32>
    %36 = vector.extract_strided_slice %34 {offsets = [0, 64], sizes = [1, 64], strides = [1, 1]} : vector<1x256xf32> to vector<1x64xf32>
    %37 = vector.extract_strided_slice %34 {offsets = [0, 192], sizes = [1, 64], strides = [1, 1]} : vector<1x256xf32> to vector<1x64xf32>
    %38 = vector.extract_strided_slice %29 {offsets = [0, 128], sizes = [1, 64], strides = [1, 1]} : vector<1x256xf32> to vector<1x64xf32>
    %39 = math.tanh %38 : vector<1x64xf32>
    %40 = arith.mulf %36, %20 : vector<1x64xf32>
    %41 = arith.mulf %35, %39 : vector<1x64xf32>
    %42 = arith.addf %40, %41 : vector<1x64xf32>
    %43 = math.tanh %42 : vector<1x64xf32>
    %44 = arith.mulf %37, %43 : vector<1x64xf32>
    %45 = arith.addf %23, %44 : vector<1x64xf32>
    %c2_i32 = arith.constant 2 : i32
    %46 = arith.index_cast %c2_i32 : i32 to index
    %47 = memref.load %arg1[%46] : memref<16xi32, #tpu.memory_space<smem>>
    %48 = arith.index_cast %47 : i32 to index
    %c0_7 = arith.constant 0 : index
    %49 = vector.load %arg2[%48, %c0_7] : memref<100x256xf32, #tpu.memory_space<vmem>>, vector<1x256xf32>
    %cst_8 = arith.constant dense<0.000000e+00> : vector<1x256xf32>
    %50 = tpu.matmul %44, %0, %cst_8 {dimension_numbers = #tpu.dot_dimension_numbers<[1], [0], [0], [1], [0, 0, 1, 1], [], []>} : vector<1x64xf32>, vector<64x256xf32>, vector<1x256xf32> -> vector<1x256xf32>
    %51 = arith.addf %49, %50 : vector<1x256xf32>
    %52 = arith.negf %51 : vector<1x256xf32>
    %53 = math.exp %52 : vector<1x256xf32>
    %cst_9 = arith.constant 1.000000e+00 : f32
    %54 = vector.broadcast %cst_9 : f32 to vector<1x256xf32>
    %55 = arith.addf %54, %53 : vector<1x256xf32>
    %56 = arith.divf %54, %55 : vector<1x256xf32>
    %57 = vector.extract_strided_slice %56 {offsets = [0, 0], sizes = [1, 64], strides = [1, 1]} : vector<1x256xf32> to vector<1x64xf32>
    %58 = vector.extract_strided_slice %56 {offsets = [0, 64], sizes = [1, 64], strides = [1, 1]} : vector<1x256xf32> to vector<1x64xf32>
    %59 = vector.extract_strided_slice %56 {offsets = [0, 192], sizes = [1, 64], strides = [1, 1]} : vector<1x256xf32> to vector<1x64xf32>
    %60 = vector.extract_strided_slice %51 {offsets = [0, 128], sizes = [1, 64], strides = [1, 1]} : vector<1x256xf32> to vector<1x64xf32>
    %61 = math.tanh %60 : vector<1x64xf32>
    %62 = arith.mulf %58, %42 : vector<1x64xf32>
    %63 = arith.mulf %57, %61 : vector<1x64xf32>
    %64 = arith.addf %62, %63 : vector<1x64xf32>
    %65 = math.tanh %64 : vector<1x64xf32>
    %66 = arith.mulf %59, %65 : vector<1x64xf32>
    %67 = arith.addf %45, %66 : vector<1x64xf32>
    %c3_i32 = arith.constant 3 : i32
    %68 = arith.index_cast %c3_i32 : i32 to index
    %69 = memref.load %arg1[%68] : memref<16xi32, #tpu.memory_space<smem>>
    %70 = arith.index_cast %69 : i32 to index
    %c0_10 = arith.constant 0 : index
    %71 = vector.load %arg2[%70, %c0_10] : memref<100x256xf32, #tpu.memory_space<vmem>>, vector<1x256xf32>
    %cst_11 = arith.constant dense<0.000000e+00> : vector<1x256xf32>
    %72 = tpu.matmul %66, %0, %cst_11 {dimension_numbers = #tpu.dot_dimension_numbers<[1], [0], [0], [1], [0, 0, 1, 1], [], []>} : vector<1x64xf32>, vector<64x256xf32>, vector<1x256xf32> -> vector<1x256xf32>
    %73 = arith.addf %71, %72 : vector<1x256xf32>
    %74 = arith.negf %73 : vector<1x256xf32>
    %75 = math.exp %74 : vector<1x256xf32>
    %cst_12 = arith.constant 1.000000e+00 : f32
    %76 = vector.broadcast %cst_12 : f32 to vector<1x256xf32>
    %77 = arith.addf %76, %75 : vector<1x256xf32>
    %78 = arith.divf %76, %77 : vector<1x256xf32>
    %79 = vector.extract_strided_slice %78 {offsets = [0, 0], sizes = [1, 64], strides = [1, 1]} : vector<1x256xf32> to vector<1x64xf32>
    %80 = vector.extract_strided_slice %78 {offsets = [0, 64], sizes = [1, 64], strides = [1, 1]} : vector<1x256xf32> to vector<1x64xf32>
    %81 = vector.extract_strided_slice %78 {offsets = [0, 192], sizes = [1, 64], strides = [1, 1]} : vector<1x256xf32> to vector<1x64xf32>
    %82 = vector.extract_strided_slice %73 {offsets = [0, 128], sizes = [1, 64], strides = [1, 1]} : vector<1x256xf32> to vector<1x64xf32>
    %83 = math.tanh %82 : vector<1x64xf32>
    %84 = arith.mulf %80, %64 : vector<1x64xf32>
    %85 = arith.mulf %79, %83 : vector<1x64xf32>
    %86 = arith.addf %84, %85 : vector<1x64xf32>
    %87 = math.tanh %86 : vector<1x64xf32>
    %88 = arith.mulf %81, %87 : vector<1x64xf32>
    %89 = arith.addf %67, %88 : vector<1x64xf32>
    %c4_i32 = arith.constant 4 : i32
    %90 = arith.index_cast %c4_i32 : i32 to index
    %91 = memref.load %arg1[%90] : memref<16xi32, #tpu.memory_space<smem>>
    %92 = arith.index_cast %91 : i32 to index
    %c0_13 = arith.constant 0 : index
    %93 = vector.load %arg2[%92, %c0_13] : memref<100x256xf32, #tpu.memory_space<vmem>>, vector<1x256xf32>
    %cst_14 = arith.constant dense<0.000000e+00> : vector<1x256xf32>
    %94 = tpu.matmul %88, %0, %cst_14 {dimension_numbers = #tpu.dot_dimension_numbers<[1], [0], [0], [1], [0, 0, 1, 1], [], []>} : vector<1x64xf32>, vector<64x256xf32>, vector<1x256xf32> -> vector<1x256xf32>
    %95 = arith.addf %93, %94 : vector<1x256xf32>
    %96 = arith.negf %95 : vector<1x256xf32>
    %97 = math.exp %96 : vector<1x256xf32>
    %cst_15 = arith.constant 1.000000e+00 : f32
    %98 = vector.broadcast %cst_15 : f32 to vector<1x256xf32>
    %99 = arith.addf %98, %97 : vector<1x256xf32>
    %100 = arith.divf %98, %99 : vector<1x256xf32>
    %101 = vector.extract_strided_slice %100 {offsets = [0, 0], sizes = [1, 64], strides = [1, 1]} : vector<1x256xf32> to vector<1x64xf32>
    %102 = vector.extract_strided_slice %100 {offsets = [0, 64], sizes = [1, 64], strides = [1, 1]} : vector<1x256xf32> to vector<1x64xf32>
    %103 = vector.extract_strided_slice %100 {offsets = [0, 192], sizes = [1, 64], strides = [1, 1]} : vector<1x256xf32> to vector<1x64xf32>
    %104 = vector.extract_strided_slice %95 {offsets = [0, 128], sizes = [1, 64], strides = [1, 1]} : vector<1x256xf32> to vector<1x64xf32>
    %105 = math.tanh %104 : vector<1x64xf32>
    %106 = arith.mulf %102, %86 : vector<1x64xf32>
    %107 = arith.mulf %101, %105 : vector<1x64xf32>
    %108 = arith.addf %106, %107 : vector<1x64xf32>
    %109 = math.tanh %108 : vector<1x64xf32>
    %110 = arith.mulf %103, %109 : vector<1x64xf32>
    %111 = arith.addf %89, %110 : vector<1x64xf32>
    %c5_i32 = arith.constant 5 : i32
    %112 = arith.index_cast %c5_i32 : i32 to index
    %113 = memref.load %arg1[%112] : memref<16xi32, #tpu.memory_space<smem>>
    %114 = arith.index_cast %113 : i32 to index
    %c0_16 = arith.constant 0 : index
    %115 = vector.load %arg2[%114, %c0_16] : memref<100x256xf32, #tpu.memory_space<vmem>>, vector<1x256xf32>
    %cst_17 = arith.constant dense<0.000000e+00> : vector<1x256xf32>
    %116 = tpu.matmul %110, %0, %cst_17 {dimension_numbers = #tpu.dot_dimension_numbers<[1], [0], [0], [1], [0, 0, 1, 1], [], []>} : vector<1x64xf32>, vector<64x256xf32>, vector<1x256xf32> -> vector<1x256xf32>
    %117 = arith.addf %115, %116 : vector<1x256xf32>
    %118 = arith.negf %117 : vector<1x256xf32>
    %119 = math.exp %118 : vector<1x256xf32>
    %cst_18 = arith.constant 1.000000e+00 : f32
    %120 = vector.broadcast %cst_18 : f32 to vector<1x256xf32>
    %121 = arith.addf %120, %119 : vector<1x256xf32>
    %122 = arith.divf %120, %121 : vector<1x256xf32>
    %123 = vector.extract_strided_slice %122 {offsets = [0, 0], sizes = [1, 64], strides = [1, 1]} : vector<1x256xf32> to vector<1x64xf32>
    %124 = vector.extract_strided_slice %122 {offsets = [0, 64], sizes = [1, 64], strides = [1, 1]} : vector<1x256xf32> to vector<1x64xf32>
    %125 = vector.extract_strided_slice %122 {offsets = [0, 192], sizes = [1, 64], strides = [1, 1]} : vector<1x256xf32> to vector<1x64xf32>
    %126 = vector.extract_strided_slice %117 {offsets = [0, 128], sizes = [1, 64], strides = [1, 1]} : vector<1x256xf32> to vector<1x64xf32>
    %127 = math.tanh %126 : vector<1x64xf32>
    %128 = arith.mulf %124, %108 : vector<1x64xf32>
    %129 = arith.mulf %123, %127 : vector<1x64xf32>
    %130 = arith.addf %128, %129 : vector<1x64xf32>
    %131 = math.tanh %130 : vector<1x64xf32>
    %132 = arith.mulf %125, %131 : vector<1x64xf32>
    %133 = arith.addf %111, %132 : vector<1x64xf32>
    %c6_i32 = arith.constant 6 : i32
    %134 = arith.index_cast %c6_i32 : i32 to index
    %135 = memref.load %arg1[%134] : memref<16xi32, #tpu.memory_space<smem>>
    %136 = arith.index_cast %135 : i32 to index
    %c0_19 = arith.constant 0 : index
    %137 = vector.load %arg2[%136, %c0_19] : memref<100x256xf32, #tpu.memory_space<vmem>>, vector<1x256xf32>
    %cst_20 = arith.constant dense<0.000000e+00> : vector<1x256xf32>
    %138 = tpu.matmul %132, %0, %cst_20 {dimension_numbers = #tpu.dot_dimension_numbers<[1], [0], [0], [1], [0, 0, 1, 1], [], []>} : vector<1x64xf32>, vector<64x256xf32>, vector<1x256xf32> -> vector<1x256xf32>
    %139 = arith.addf %137, %138 : vector<1x256xf32>
    %140 = arith.negf %139 : vector<1x256xf32>
    %141 = math.exp %140 : vector<1x256xf32>
    %cst_21 = arith.constant 1.000000e+00 : f32
    %142 = vector.broadcast %cst_21 : f32 to vector<1x256xf32>
    %143 = arith.addf %142, %141 : vector<1x256xf32>
    %144 = arith.divf %142, %143 : vector<1x256xf32>
    %145 = vector.extract_strided_slice %144 {offsets = [0, 0], sizes = [1, 64], strides = [1, 1]} : vector<1x256xf32> to vector<1x64xf32>
    %146 = vector.extract_strided_slice %144 {offsets = [0, 64], sizes = [1, 64], strides = [1, 1]} : vector<1x256xf32> to vector<1x64xf32>
    %147 = vector.extract_strided_slice %144 {offsets = [0, 192], sizes = [1, 64], strides = [1, 1]} : vector<1x256xf32> to vector<1x64xf32>
    %148 = vector.extract_strided_slice %139 {offsets = [0, 128], sizes = [1, 64], strides = [1, 1]} : vector<1x256xf32> to vector<1x64xf32>
    %149 = math.tanh %148 : vector<1x64xf32>
    %150 = arith.mulf %146, %130 : vector<1x64xf32>
    %151 = arith.mulf %145, %149 : vector<1x64xf32>
    %152 = arith.addf %150, %151 : vector<1x64xf32>
    %153 = math.tanh %152 : vector<1x64xf32>
    %154 = arith.mulf %147, %153 : vector<1x64xf32>
    %155 = arith.addf %133, %154 : vector<1x64xf32>
    %c7_i32 = arith.constant 7 : i32
    %156 = arith.index_cast %c7_i32 : i32 to index
    %157 = memref.load %arg1[%156] : memref<16xi32, #tpu.memory_space<smem>>
    %158 = arith.index_cast %157 : i32 to index
    %c0_22 = arith.constant 0 : index
    %159 = vector.load %arg2[%158, %c0_22] : memref<100x256xf32, #tpu.memory_space<vmem>>, vector<1x256xf32>
    %cst_23 = arith.constant dense<0.000000e+00> : vector<1x256xf32>
    %160 = tpu.matmul %154, %0, %cst_23 {dimension_numbers = #tpu.dot_dimension_numbers<[1], [0], [0], [1], [0, 0, 1, 1], [], []>} : vector<1x64xf32>, vector<64x256xf32>, vector<1x256xf32> -> vector<1x256xf32>
    %161 = arith.addf %159, %160 : vector<1x256xf32>
    %162 = arith.negf %161 : vector<1x256xf32>
    %163 = math.exp %162 : vector<1x256xf32>
    %cst_24 = arith.constant 1.000000e+00 : f32
    %164 = vector.broadcast %cst_24 : f32 to vector<1x256xf32>
    %165 = arith.addf %164, %163 : vector<1x256xf32>
    %166 = arith.divf %164, %165 : vector<1x256xf32>
    %167 = vector.extract_strided_slice %166 {offsets = [0, 0], sizes = [1, 64], strides = [1, 1]} : vector<1x256xf32> to vector<1x64xf32>
    %168 = vector.extract_strided_slice %166 {offsets = [0, 64], sizes = [1, 64], strides = [1, 1]} : vector<1x256xf32> to vector<1x64xf32>
    %169 = vector.extract_strided_slice %166 {offsets = [0, 192], sizes = [1, 64], strides = [1, 1]} : vector<1x256xf32> to vector<1x64xf32>
    %170 = vector.extract_strided_slice %161 {offsets = [0, 128], sizes = [1, 64], strides = [1, 1]} : vector<1x256xf32> to vector<1x64xf32>
    %171 = math.tanh %170 : vector<1x64xf32>
    %172 = arith.mulf %168, %152 : vector<1x64xf32>
    %173 = arith.mulf %167, %171 : vector<1x64xf32>
    %174 = arith.addf %172, %173 : vector<1x64xf32>
    %175 = math.tanh %174 : vector<1x64xf32>
    %176 = arith.mulf %169, %175 : vector<1x64xf32>
    %177 = arith.addf %155, %176 : vector<1x64xf32>
    %c8_i32 = arith.constant 8 : i32
    %178 = arith.index_cast %c8_i32 : i32 to index
    %179 = memref.load %arg1[%178] : memref<16xi32, #tpu.memory_space<smem>>
    %180 = arith.index_cast %179 : i32 to index
    %c0_25 = arith.constant 0 : index
    %181 = vector.load %arg2[%180, %c0_25] : memref<100x256xf32, #tpu.memory_space<vmem>>, vector<1x256xf32>
    %cst_26 = arith.constant dense<0.000000e+00> : vector<1x256xf32>
    %182 = tpu.matmul %176, %0, %cst_26 {dimension_numbers = #tpu.dot_dimension_numbers<[1], [0], [0], [1], [0, 0, 1, 1], [], []>} : vector<1x64xf32>, vector<64x256xf32>, vector<1x256xf32> -> vector<1x256xf32>
    %183 = arith.addf %181, %182 : vector<1x256xf32>
    %184 = arith.negf %183 : vector<1x256xf32>
    %185 = math.exp %184 : vector<1x256xf32>
    %cst_27 = arith.constant 1.000000e+00 : f32
    %186 = vector.broadcast %cst_27 : f32 to vector<1x256xf32>
    %187 = arith.addf %186, %185 : vector<1x256xf32>
    %188 = arith.divf %186, %187 : vector<1x256xf32>
    %189 = vector.extract_strided_slice %188 {offsets = [0, 0], sizes = [1, 64], strides = [1, 1]} : vector<1x256xf32> to vector<1x64xf32>
    %190 = vector.extract_strided_slice %188 {offsets = [0, 64], sizes = [1, 64], strides = [1, 1]} : vector<1x256xf32> to vector<1x64xf32>
    %191 = vector.extract_strided_slice %188 {offsets = [0, 192], sizes = [1, 64], strides = [1, 1]} : vector<1x256xf32> to vector<1x64xf32>
    %192 = vector.extract_strided_slice %183 {offsets = [0, 128], sizes = [1, 64], strides = [1, 1]} : vector<1x256xf32> to vector<1x64xf32>
    %193 = math.tanh %192 : vector<1x64xf32>
    %194 = arith.mulf %190, %174 : vector<1x64xf32>
    %195 = arith.mulf %189, %193 : vector<1x64xf32>
    %196 = arith.addf %194, %195 : vector<1x64xf32>
    %197 = math.tanh %196 : vector<1x64xf32>
    %198 = arith.mulf %191, %197 : vector<1x64xf32>
    %199 = arith.addf %177, %198 : vector<1x64xf32>
    %c9_i32 = arith.constant 9 : i32
    %200 = arith.index_cast %c9_i32 : i32 to index
    %201 = memref.load %arg1[%200] : memref<16xi32, #tpu.memory_space<smem>>
    %202 = arith.index_cast %201 : i32 to index
    %c0_28 = arith.constant 0 : index
    %203 = vector.load %arg2[%202, %c0_28] : memref<100x256xf32, #tpu.memory_space<vmem>>, vector<1x256xf32>
    %cst_29 = arith.constant dense<0.000000e+00> : vector<1x256xf32>
    %204 = tpu.matmul %198, %0, %cst_29 {dimension_numbers = #tpu.dot_dimension_numbers<[1], [0], [0], [1], [0, 0, 1, 1], [], []>} : vector<1x64xf32>, vector<64x256xf32>, vector<1x256xf32> -> vector<1x256xf32>
    %205 = arith.addf %203, %204 : vector<1x256xf32>
    %206 = arith.negf %205 : vector<1x256xf32>
    %207 = math.exp %206 : vector<1x256xf32>
    %cst_30 = arith.constant 1.000000e+00 : f32
    %208 = vector.broadcast %cst_30 : f32 to vector<1x256xf32>
    %209 = arith.addf %208, %207 : vector<1x256xf32>
    %210 = arith.divf %208, %209 : vector<1x256xf32>
    %211 = vector.extract_strided_slice %210 {offsets = [0, 0], sizes = [1, 64], strides = [1, 1]} : vector<1x256xf32> to vector<1x64xf32>
    %212 = vector.extract_strided_slice %210 {offsets = [0, 64], sizes = [1, 64], strides = [1, 1]} : vector<1x256xf32> to vector<1x64xf32>
    %213 = vector.extract_strided_slice %210 {offsets = [0, 192], sizes = [1, 64], strides = [1, 1]} : vector<1x256xf32> to vector<1x64xf32>
    %214 = vector.extract_strided_slice %205 {offsets = [0, 128], sizes = [1, 64], strides = [1, 1]} : vector<1x256xf32> to vector<1x64xf32>
    %215 = math.tanh %214 : vector<1x64xf32>
    %216 = arith.mulf %212, %196 : vector<1x64xf32>
    %217 = arith.mulf %211, %215 : vector<1x64xf32>
    %218 = arith.addf %216, %217 : vector<1x64xf32>
    %219 = math.tanh %218 : vector<1x64xf32>
    %220 = arith.mulf %213, %219 : vector<1x64xf32>
    %221 = arith.addf %199, %220 : vector<1x64xf32>
    %c10_i32 = arith.constant 10 : i32
    %222 = arith.index_cast %c10_i32 : i32 to index
    %223 = memref.load %arg1[%222] : memref<16xi32, #tpu.memory_space<smem>>
    %224 = arith.index_cast %223 : i32 to index
    %c0_31 = arith.constant 0 : index
    %225 = vector.load %arg2[%224, %c0_31] : memref<100x256xf32, #tpu.memory_space<vmem>>, vector<1x256xf32>
    %cst_32 = arith.constant dense<0.000000e+00> : vector<1x256xf32>
    %226 = tpu.matmul %220, %0, %cst_32 {dimension_numbers = #tpu.dot_dimension_numbers<[1], [0], [0], [1], [0, 0, 1, 1], [], []>} : vector<1x64xf32>, vector<64x256xf32>, vector<1x256xf32> -> vector<1x256xf32>
    %227 = arith.addf %225, %226 : vector<1x256xf32>
    %228 = arith.negf %227 : vector<1x256xf32>
    %229 = math.exp %228 : vector<1x256xf32>
    %cst_33 = arith.constant 1.000000e+00 : f32
    %230 = vector.broadcast %cst_33 : f32 to vector<1x256xf32>
    %231 = arith.addf %230, %229 : vector<1x256xf32>
    %232 = arith.divf %230, %231 : vector<1x256xf32>
    %233 = vector.extract_strided_slice %232 {offsets = [0, 0], sizes = [1, 64], strides = [1, 1]} : vector<1x256xf32> to vector<1x64xf32>
    %234 = vector.extract_strided_slice %232 {offsets = [0, 64], sizes = [1, 64], strides = [1, 1]} : vector<1x256xf32> to vector<1x64xf32>
    %235 = vector.extract_strided_slice %232 {offsets = [0, 192], sizes = [1, 64], strides = [1, 1]} : vector<1x256xf32> to vector<1x64xf32>
    %236 = vector.extract_strided_slice %227 {offsets = [0, 128], sizes = [1, 64], strides = [1, 1]} : vector<1x256xf32> to vector<1x64xf32>
    %237 = math.tanh %236 : vector<1x64xf32>
    %238 = arith.mulf %234, %218 : vector<1x64xf32>
    %239 = arith.mulf %233, %237 : vector<1x64xf32>
    %240 = arith.addf %238, %239 : vector<1x64xf32>
    %241 = math.tanh %240 : vector<1x64xf32>
    %242 = arith.mulf %235, %241 : vector<1x64xf32>
    %243 = arith.addf %221, %242 : vector<1x64xf32>
    %c11_i32 = arith.constant 11 : i32
    %244 = arith.index_cast %c11_i32 : i32 to index
    %245 = memref.load %arg1[%244] : memref<16xi32, #tpu.memory_space<smem>>
    %246 = arith.index_cast %245 : i32 to index
    %c0_34 = arith.constant 0 : index
    %247 = vector.load %arg2[%246, %c0_34] : memref<100x256xf32, #tpu.memory_space<vmem>>, vector<1x256xf32>
    %cst_35 = arith.constant dense<0.000000e+00> : vector<1x256xf32>
    %248 = tpu.matmul %242, %0, %cst_35 {dimension_numbers = #tpu.dot_dimension_numbers<[1], [0], [0], [1], [0, 0, 1, 1], [], []>} : vector<1x64xf32>, vector<64x256xf32>, vector<1x256xf32> -> vector<1x256xf32>
    %249 = arith.addf %247, %248 : vector<1x256xf32>
    %250 = arith.negf %249 : vector<1x256xf32>
    %251 = math.exp %250 : vector<1x256xf32>
    %cst_36 = arith.constant 1.000000e+00 : f32
    %252 = vector.broadcast %cst_36 : f32 to vector<1x256xf32>
    %253 = arith.addf %252, %251 : vector<1x256xf32>
    %254 = arith.divf %252, %253 : vector<1x256xf32>
    %255 = vector.extract_strided_slice %254 {offsets = [0, 0], sizes = [1, 64], strides = [1, 1]} : vector<1x256xf32> to vector<1x64xf32>
    %256 = vector.extract_strided_slice %254 {offsets = [0, 64], sizes = [1, 64], strides = [1, 1]} : vector<1x256xf32> to vector<1x64xf32>
    %257 = vector.extract_strided_slice %254 {offsets = [0, 192], sizes = [1, 64], strides = [1, 1]} : vector<1x256xf32> to vector<1x64xf32>
    %258 = vector.extract_strided_slice %249 {offsets = [0, 128], sizes = [1, 64], strides = [1, 1]} : vector<1x256xf32> to vector<1x64xf32>
    %259 = math.tanh %258 : vector<1x64xf32>
    %260 = arith.mulf %256, %240 : vector<1x64xf32>
    %261 = arith.mulf %255, %259 : vector<1x64xf32>
    %262 = arith.addf %260, %261 : vector<1x64xf32>
    %263 = math.tanh %262 : vector<1x64xf32>
    %264 = arith.mulf %257, %263 : vector<1x64xf32>
    %265 = arith.addf %243, %264 : vector<1x64xf32>
    %c12_i32 = arith.constant 12 : i32
    %266 = arith.index_cast %c12_i32 : i32 to index
    %267 = memref.load %arg1[%266] : memref<16xi32, #tpu.memory_space<smem>>
    %268 = arith.index_cast %267 : i32 to index
    %c0_37 = arith.constant 0 : index
    %269 = vector.load %arg2[%268, %c0_37] : memref<100x256xf32, #tpu.memory_space<vmem>>, vector<1x256xf32>
    %cst_38 = arith.constant dense<0.000000e+00> : vector<1x256xf32>
    %270 = tpu.matmul %264, %0, %cst_38 {dimension_numbers = #tpu.dot_dimension_numbers<[1], [0], [0], [1], [0, 0, 1, 1], [], []>} : vector<1x64xf32>, vector<64x256xf32>, vector<1x256xf32> -> vector<1x256xf32>
    %271 = arith.addf %269, %270 : vector<1x256xf32>
    %272 = arith.negf %271 : vector<1x256xf32>
    %273 = math.exp %272 : vector<1x256xf32>
    %cst_39 = arith.constant 1.000000e+00 : f32
    %274 = vector.broadcast %cst_39 : f32 to vector<1x256xf32>
    %275 = arith.addf %274, %273 : vector<1x256xf32>
    %276 = arith.divf %274, %275 : vector<1x256xf32>
    %277 = vector.extract_strided_slice %276 {offsets = [0, 0], sizes = [1, 64], strides = [1, 1]} : vector<1x256xf32> to vector<1x64xf32>
    %278 = vector.extract_strided_slice %276 {offsets = [0, 64], sizes = [1, 64], strides = [1, 1]} : vector<1x256xf32> to vector<1x64xf32>
    %279 = vector.extract_strided_slice %276 {offsets = [0, 192], sizes = [1, 64], strides = [1, 1]} : vector<1x256xf32> to vector<1x64xf32>
    %280 = vector.extract_strided_slice %271 {offsets = [0, 128], sizes = [1, 64], strides = [1, 1]} : vector<1x256xf32> to vector<1x64xf32>
    %281 = math.tanh %280 : vector<1x64xf32>
    %282 = arith.mulf %278, %262 : vector<1x64xf32>
    %283 = arith.mulf %277, %281 : vector<1x64xf32>
    %284 = arith.addf %282, %283 : vector<1x64xf32>
    %285 = math.tanh %284 : vector<1x64xf32>
    %286 = arith.mulf %279, %285 : vector<1x64xf32>
    %287 = arith.addf %265, %286 : vector<1x64xf32>
    %c13_i32 = arith.constant 13 : i32
    %288 = arith.index_cast %c13_i32 : i32 to index
    %289 = memref.load %arg1[%288] : memref<16xi32, #tpu.memory_space<smem>>
    %290 = arith.index_cast %289 : i32 to index
    %c0_40 = arith.constant 0 : index
    %291 = vector.load %arg2[%290, %c0_40] : memref<100x256xf32, #tpu.memory_space<vmem>>, vector<1x256xf32>
    %cst_41 = arith.constant dense<0.000000e+00> : vector<1x256xf32>
    %292 = tpu.matmul %286, %0, %cst_41 {dimension_numbers = #tpu.dot_dimension_numbers<[1], [0], [0], [1], [0, 0, 1, 1], [], []>} : vector<1x64xf32>, vector<64x256xf32>, vector<1x256xf32> -> vector<1x256xf32>
    %293 = arith.addf %291, %292 : vector<1x256xf32>
    %294 = arith.negf %293 : vector<1x256xf32>
    %295 = math.exp %294 : vector<1x256xf32>
    %cst_42 = arith.constant 1.000000e+00 : f32
    %296 = vector.broadcast %cst_42 : f32 to vector<1x256xf32>
    %297 = arith.addf %296, %295 : vector<1x256xf32>
    %298 = arith.divf %296, %297 : vector<1x256xf32>
    %299 = vector.extract_strided_slice %298 {offsets = [0, 0], sizes = [1, 64], strides = [1, 1]} : vector<1x256xf32> to vector<1x64xf32>
    %300 = vector.extract_strided_slice %298 {offsets = [0, 64], sizes = [1, 64], strides = [1, 1]} : vector<1x256xf32> to vector<1x64xf32>
    %301 = vector.extract_strided_slice %298 {offsets = [0, 192], sizes = [1, 64], strides = [1, 1]} : vector<1x256xf32> to vector<1x64xf32>
    %302 = vector.extract_strided_slice %293 {offsets = [0, 128], sizes = [1, 64], strides = [1, 1]} : vector<1x256xf32> to vector<1x64xf32>
    %303 = math.tanh %302 : vector<1x64xf32>
    %304 = arith.mulf %300, %284 : vector<1x64xf32>
    %305 = arith.mulf %299, %303 : vector<1x64xf32>
    %306 = arith.addf %304, %305 : vector<1x64xf32>
    %307 = math.tanh %306 : vector<1x64xf32>
    %308 = arith.mulf %301, %307 : vector<1x64xf32>
    %309 = arith.addf %287, %308 : vector<1x64xf32>
    %c14_i32 = arith.constant 14 : i32
    %310 = arith.index_cast %c14_i32 : i32 to index
    %311 = memref.load %arg1[%310] : memref<16xi32, #tpu.memory_space<smem>>
    %312 = arith.index_cast %311 : i32 to index
    %c0_43 = arith.constant 0 : index
    %313 = vector.load %arg2[%312, %c0_43] : memref<100x256xf32, #tpu.memory_space<vmem>>, vector<1x256xf32>
    %cst_44 = arith.constant dense<0.000000e+00> : vector<1x256xf32>
    %314 = tpu.matmul %308, %0, %cst_44 {dimension_numbers = #tpu.dot_dimension_numbers<[1], [0], [0], [1], [0, 0, 1, 1], [], []>} : vector<1x64xf32>, vector<64x256xf32>, vector<1x256xf32> -> vector<1x256xf32>
    %315 = arith.addf %313, %314 : vector<1x256xf32>
    %316 = arith.negf %315 : vector<1x256xf32>
    %317 = math.exp %316 : vector<1x256xf32>
    %cst_45 = arith.constant 1.000000e+00 : f32
    %318 = vector.broadcast %cst_45 : f32 to vector<1x256xf32>
    %319 = arith.addf %318, %317 : vector<1x256xf32>
    %320 = arith.divf %318, %319 : vector<1x256xf32>
    %321 = vector.extract_strided_slice %320 {offsets = [0, 0], sizes = [1, 64], strides = [1, 1]} : vector<1x256xf32> to vector<1x64xf32>
    %322 = vector.extract_strided_slice %320 {offsets = [0, 64], sizes = [1, 64], strides = [1, 1]} : vector<1x256xf32> to vector<1x64xf32>
    %323 = vector.extract_strided_slice %320 {offsets = [0, 192], sizes = [1, 64], strides = [1, 1]} : vector<1x256xf32> to vector<1x64xf32>
    %324 = vector.extract_strided_slice %315 {offsets = [0, 128], sizes = [1, 64], strides = [1, 1]} : vector<1x256xf32> to vector<1x64xf32>
    %325 = math.tanh %324 : vector<1x64xf32>
    %326 = arith.mulf %322, %306 : vector<1x64xf32>
    %327 = arith.mulf %321, %325 : vector<1x64xf32>
    %328 = arith.addf %326, %327 : vector<1x64xf32>
    %329 = math.tanh %328 : vector<1x64xf32>
    %330 = arith.mulf %323, %329 : vector<1x64xf32>
    %331 = arith.addf %309, %330 : vector<1x64xf32>
    %c15_i32 = arith.constant 15 : i32
    %332 = arith.index_cast %c15_i32 : i32 to index
    %333 = memref.load %arg1[%332] : memref<16xi32, #tpu.memory_space<smem>>
    %334 = arith.index_cast %333 : i32 to index
    %c0_46 = arith.constant 0 : index
    %335 = vector.load %arg2[%334, %c0_46] : memref<100x256xf32, #tpu.memory_space<vmem>>, vector<1x256xf32>
    %cst_47 = arith.constant dense<0.000000e+00> : vector<1x256xf32>
    %336 = tpu.matmul %330, %0, %cst_47 {dimension_numbers = #tpu.dot_dimension_numbers<[1], [0], [0], [1], [0, 0, 1, 1], [], []>} : vector<1x64xf32>, vector<64x256xf32>, vector<1x256xf32> -> vector<1x256xf32>
    %337 = arith.addf %335, %336 : vector<1x256xf32>
    %338 = arith.negf %337 : vector<1x256xf32>
    %339 = math.exp %338 : vector<1x256xf32>
    %cst_48 = arith.constant 1.000000e+00 : f32
    %340 = vector.broadcast %cst_48 : f32 to vector<1x256xf32>
    %341 = arith.addf %340, %339 : vector<1x256xf32>
    %342 = arith.divf %340, %341 : vector<1x256xf32>
    %343 = vector.extract_strided_slice %342 {offsets = [0, 0], sizes = [1, 64], strides = [1, 1]} : vector<1x256xf32> to vector<1x64xf32>
    %344 = vector.extract_strided_slice %342 {offsets = [0, 64], sizes = [1, 64], strides = [1, 1]} : vector<1x256xf32> to vector<1x64xf32>
    %345 = vector.extract_strided_slice %342 {offsets = [0, 192], sizes = [1, 64], strides = [1, 1]} : vector<1x256xf32> to vector<1x64xf32>
    %346 = vector.extract_strided_slice %337 {offsets = [0, 128], sizes = [1, 64], strides = [1, 1]} : vector<1x256xf32> to vector<1x64xf32>
    %347 = math.tanh %346 : vector<1x64xf32>
    %348 = arith.mulf %344, %328 : vector<1x64xf32>
    %349 = arith.mulf %343, %347 : vector<1x64xf32>
    %350 = arith.addf %348, %349 : vector<1x64xf32>
    %351 = math.tanh %350 : vector<1x64xf32>
    %352 = arith.mulf %345, %351 : vector<1x64xf32>
    %353 = arith.addf %331, %352 : vector<1x64xf32>
    %c16_i32 = arith.constant 16 : i32
    %cst_49 = arith.constant 6.250000e-02 : f32
    %354 = vector.broadcast %cst_49 : f32 to vector<1x64xf32>
    %355 = arith.mulf %353, %354 : vector<1x64xf32>
    %c0_50 = arith.constant 0 : index
    %c0_51 = arith.constant 0 : index
    %356 = vector.load %arg4[%c0_50, %c0_51] : memref<64x128xf32, #tpu.memory_space<vmem>>, vector<64x128xf32>
    %cst_52 = arith.constant dense<0.000000e+00> : vector<1x128xf32>
    %357 = tpu.matmul %355, %356, %cst_52 {dimension_numbers = #tpu.dot_dimension_numbers<[1], [0], [0], [1], [0, 0, 1, 1], [], []>} : vector<1x64xf32>, vector<64x128xf32>, vector<1x128xf32> -> vector<1x128xf32>
    %c0_53 = arith.constant 0 : index
    %c0_54 = arith.constant 0 : index
    %358 = vector.load %arg5[%c0_53, %c0_54] : memref<1x128xf32, #tpu.memory_space<vmem>>, vector<1x128xf32>
    %359 = arith.addf %357, %358 : vector<1x128xf32>
    %c0_55 = arith.constant 0 : index
    %c0_56 = arith.constant 0 : index
    %360 = vector.load %arg6[%c0_55, %c0_56] : memref<1x128xf32, #tpu.memory_space<vmem>>, vector<1x128xf32>
    tpu.vector_store %arg6[%c0_55, %c0_56], %359 {strides = array<i32>} : memref<1x128xf32, #tpu.memory_space<vmem>>, vector<1x128xf32>,
    return
  }
  func.func @transform_0(%arg0: i32, %arg1: memref<16xi32, #tpu.memory_space<smem>>) -> (i32, i32) {
    %c0_i32 = arith.constant 0 : i32
    %c0_i32_0 = arith.constant 0 : i32
    %c0_i32_1 = arith.constant 0 : i32
    return %c0_i32, %c0_i32_0 : i32, i32
  }
  func.func @transform_1(%arg0: i32, %arg1: memref<16xi32, #tpu.memory_space<smem>>) -> (i32, i32) {
    %c0_i32 = arith.constant 0 : i32
    %c0_i32_0 = arith.constant 0 : i32
    %c0_i32_1 = arith.constant 0 : i32
    return %c0_i32, %c0_i32_0 : i32, i32
  }
  func.func @transform_2(%arg0: i32, %arg1: memref<16xi32, #tpu.memory_space<smem>>) -> (i32, i32) {
    %c0_i32 = arith.constant 0 : i32
    %c0_i32_0 = arith.constant 0 : i32
    %c0_i32_1 = arith.constant 0 : i32
    return %c0_i32, %c0_i32_0 : i32, i32
  }
  func.func @transform_3(%arg0: i32, %arg1: memref<16xi32, #tpu.memory_space<smem>>) -> (i32, i32) {
    %c0_i32 = arith.constant 0 : i32
    %c0_i32_0 = arith.constant 0 : i32
    %c0_i32_1 = arith.constant 0 : i32
    return %c0_i32, %c0_i32_0 : i32, i32
  }
  func.func @transform_4(%arg0: i32, %arg1: memref<16xi32, #tpu.memory_space<smem>>) -> (i32, i32) {
    %c0_i32 = arith.constant 0 : i32
    %c0_i32_0 = arith.constant 0 : i32
    %c0_i32_1 = arith.constant 0 : i32
    return %c0_i32, %c0_i32_0 : i32, i32
  }
}

</mosaic_0001>

<bundles_post_ra>
// kernel: aste_forward.1
= control target key start
LH: loop header
LB: loop body
LE: loop exit
PB: predicated region body
PF: predicated region fallthrough
CT: control target
= control target key end

     0   :  { %s2683_s18 = smov [#allocation3]   ;;  %s3198_s0 = inlined_call_operand.hbm [shape: s32[16], index: 0, kind: input, shape index: {}]   ;;  %s3199_s1 = inlined_call_operand.hbm [shape: f32[100,256], index: 1, kind: input, shape index: {}]   ;;  %s3200_s2 = inlined_call_operand.hbm [shape: f32[64,256], index: 2, kind: input, shape index: {}]   ;;  %s3201_s3 = inlined_call_operand.hbm [shape: f32[64,128], index: 3, kind: input, shape index: {}]   ;;  %s3202_s4 = inlined_call_operand.vmem [shape: f32[1,128], index: 4, kind: input, shape index: {}]   ;;  %s3203_s5 = inlined_call_operand.vmem [shape: f32[1,128], index: 5, kind: output, shape index: {}]  }
   0x1   :  { %11 = dma.hbm_to_smem %s3198_s0, 16, %s2683_s18, [#allocation2] }
   0x2   :  { %2677 = dma.done.wait [#allocation2], 16 }
   0x3   :  { %2678 = vsyncadd [#allocation2], 4294967280 }
   0x4   :  { %13 = sfence }
   0x5   :  { %14 = vsyncpa [#allocation5], 0 }
   0x6   :  { %15 = vsyncpa [#allocation7], 0  ;;  %s2684_s21 = smov [#allocation6]   ;;  %s2685_s23 = smov [#allocation4]  }
   0x7   :  { %s33_s22 = sshll.u32 %s2684_s21, 4  ;;  %s21_s24 = sshll.u32 %s2685_s23, 4  ;;  %s34_s22 = int_to_ptr.vmem [resolvable:$true] %s33_s22  ;;  %s22_s24 = int_to_ptr.vmem [resolvable:$true] %s21_s24 }
   0x8   :  { %s2625_s25 = scalar_lea.vmem %s34_s22, 2048  ;;  %p2630_p1 = scmp.lt.s32.totalorder %s34_s22, %s34_s22 }
   0x9   :  { %p2626_p0 = scmp.ne.s32.totalorder %s34_s22, %s2625_s25  ;;  %p2631_p2 = scmp.lt.s32.totalorder %s2625_s25, %s2625_s25 }
   0xb   :  { %p2632_p3 = por %p2631_p2, %p2630_p1 }
   0xd   :  { %p2633_p4 = pnand %p2632_p3, %p2626_p0 }
   0xf   :  { %2636 = shalt.err (!%p2633_p4)
}
  0x10   :  { %s2686_s26 = smov 256   ;;  %s2687_s0 = smov 16  }
  0x11   :  { %39 = dma.hbm_to_vmem [thread:$0]  %s3200_s2, 2048, %s34_s22, [#allocation7], %s2686_s26, %s2686_s26, %s2687_s0  }
  0x12   :  { %s2645_s29 = scalar_lea.vmem %s22_s24, 3328  ;;  %p2650_p6 = scmp.lt.s32.totalorder %s22_s24, %s22_s24 }
  0x13   :  { %p2646_p5 = scmp.ne.s32.totalorder %s22_s24, %s2645_s29  ;;  %p2651_p7 = scmp.lt.s32.totalorder %s2645_s29, %s2645_s29 }
  0x15   :  { %p2652_p8 = por %p2651_p7, %p2650_p6 }
  0x17   :  { %p2653_p9 = pnand %p2652_p8, %p2646_p5 }
  0x19   :  { %2656 = shalt.err (!%p2653_p9)
}
  0x1a   :  { %27 = dma.hbm_to_vmem [thread:$0]  %s3199_s1, 3328, %s22_s24, [#allocation5], %s2686_s26, %s2686_s26, %s2687_s0  }
  0x1b   :  { %s2688_s7 = smov [#allocation8]  }
  0x1c   :  { %s45_s8 = sshll.u32 %s2688_s7, 4  ;;  %s46_s8 = int_to_ptr.vmem [resolvable:$true] %s45_s8 }
  0x1d   :  { %s2665_s9 = scalar_lea.vmem %s46_s8, 1024  ;;  %p2670_p11 = scmp.lt.s32.totalorder %s46_s8, %s46_s8 }
  0x1e   :  { %p2666_p10 = scmp.ne.s32.totalorder %s46_s8, %s2665_s9  ;;  %p2671_p12 = scmp.lt.s32.totalorder %s2665_s9, %s2665_s9 }
  0x20   :  { %p2672_p13 = por %p2671_p12, %p2670_p11 }
  0x22   :  { %p2673_p0 = pnand %p2672_p13, %p2666_p10 }
  0x24   :  { %2676 = shalt.err (!%p2673_p0)
}
  0x25   :  { %s2689_s2 = smov 128   ;;  %s2690_s10 = smov 8  }
  0x26   :  { %51 = dma.hbm_to_vmem [thread:$0]  %s3201_s3, 1024, %s46_s8, [#allocation7], %s2689_s2, %s2689_s2, %s2690_s10  }
  0x27   :  { %2679 = dma.done.wait [#allocation5], 3328  }
  0x28   :  { %2680 = vsyncadd [#allocation5], 4294963968 }
  0x29   :  { %2681 = dma.done.wait [#allocation7], 3072  }
  0x2a   :  { %2682 = vsyncadd [#allocation7], 4294964224  ;;  %v2691_v0 = vmov 0.0   ;;  %v2739_v1 = vld [vmem:[#allocation6 + $0x78] sm:$0xff]  ;;  %v2741_v2 = vld [vmem:[#allocation6 + $0x70] sm:$0xff]  ;;  %s79_s1 = sld [smem:[#allocation3]]  ;;  %v170_v19 = vlaneseq }
  0x2b   :  { %157 = vmatprep.mubr.f32.mxu0 %v2691_v0  ;;  %289 = vmatprep.mubr.f32.mxu1 %v2691_v0  ;;  %v2743_v3 = vld [vmem:[#allocation6 + $0x68] sm:$0xff]  ;;  %v2746_v4 = vld [vmem:[#allocation6 + $0x60] sm:$0xff]  ;;  %v2750_v5 = vld [vmem:[#allocation6 + $0x58] sm:$0xff]  ;;  %v2692_v17 = vmov 1966171168   ;;  %s2693_s17 = smov 64  }
  0x2c   :  { %109 = vmatprep.subr.mxu0 %v2739_v1  ;;  %241 = vmatprep.subr.mxu1 %v2739_v1  ;;  %v2754_v6 = vld [vmem:[#allocation6 + $0x50] sm:$0xff]  ;;  %v2758_v7 = vld [vmem:[#allocation6 + $0x48] sm:$0xff]  ;;  %v2762_v8 = vld [vmem:[#allocation6 + $0x40] sm:$0xff]  ;;  %v168_v18 = vunpack.c.l.s4 %v2692_v17  ;;  %v171_v21 = vshrl.u32 %v170_v19, 7  ;;  %vm89_vm0 = vcmask 523264   ;;  %s2333_s18 = sld [smem:[#allocation3 + $0x1]] }
  0x2d   :  { %110 = vmatpush1.msra.mxu0 %v2741_v2  ;;  %242 = vmatpush1.msra.mxu1 %v2741_v2  ;;  %v2766_v9 = vld [vmem:[#allocation6 + $0x38] sm:$0xff]  ;;  %v2770_v10 = vld [vmem:[#allocation6 + $0x30] sm:$0xff]  ;;  %v2774_v11 = vld [vmem:[#allocation6 + $0x28] sm:$0xff]  ;;  %s2338_s24 = sld [smem:[#allocation3 + $0x2]]  ;;  %vm2694_vm1 = vmmov 0  }
  0x2e   :  { %111 = vmatprep.subr.mxu0 %v2743_v3  ;;  %243 = vmatprep.subr.mxu1 %v2743_v3  ;;  %v2778_v12 = vld [vmem:[#allocation6 + $0x20] sm:$0xff]  ;;  %v2782_v13 = vld [vmem:[#allocation6 + $0x18] sm:$0xff]  ;;  %v2786_v14 = vld [vmem:[#allocation6 + $0x10] sm:$0xff]  ;;  %v169_v20 = vunpack.c.0.s8 %v168_v18  ;;  %s2343_s29 = sld [smem:[#allocation3 + $0x3]] }
  0x2f   :  { %112 = vmatpush1.msra.mxu0 %v2746_v4  ;;  %244 = vmatpush1.msra.mxu1 %v2746_v4  ;;  %v2790_v15 = vld [vmem:[#allocation6 + $0x8] sm:$0xff]  ;;  %v2794_v16 = vld [vmem:[#allocation6] sm:$0xff]  ;;  %s2348_s2 = sld [smem:[#allocation3 + $0x4]] }
  0x30   :  { %113 = vmatprep.subr.mxu0 %v2750_v5  ;;  %245 = vmatprep.subr.mxu1 %v2750_v5  ;;  %s80_s3 = sshra.s32 %s79_s1, 3  ;;  %s83_s13 = sand.u32 7, %s79_s1  ;;  %v2823_v23 = vsub.s32 %v169_v20, %v171_v21 }
  0x31   :  { %114 = vmatpush1.msra.mxu0 %v2754_v6  ;;  %246 = vmatpush1.msra.mxu1 %v2754_v6  ;;  %s2409_s14 = sshll.u32 %s80_s3, 4 }
  0x32   :  { %115 = vmatprep.subr.mxu0 %v2758_v7  ;;  %247 = vmatprep.subr.mxu1 %v2758_v7  ;;  %s86_s15 = sadd.s32 %s2409_s14, %s83_s13  ;;  %s213_s19 = sshra.s32 %s2333_s18, 3 }
  0x33   :  { %116 = vmatpush1.msra.mxu0 %v2762_v8  ;;  %248 = vmatpush1.msra.mxu1 %v2762_v8  ;;  %s87_s16 = scalar_lea.vmem [#allocation4], %s86_s15  ;;  %s216_s20 = sand.u32 7, %s2333_s18 }
  0x34   :  { %117 = vmatprep.subr.mxu0 %v2766_v9  ;;  %249 = vmatprep.subr.mxu1 %v2766_v9  ;;  %v88_v27 = vld [vmem:[%s87_s16] ss:$8 sm:$0x3]  ;;  %s2410_s21 = sshll.u32 %s213_s19, 4  ;;  %s345_s25 = sshra.s32 %s2338_s24, 3 }
  0x35   :  { %118 = vmatpush1.msra.mxu0 %v2770_v10  ;;  %250 = vmatpush1.msra.mxu1 %v2770_v10  ;;  %s219_s22 = sadd.s32 %s2410_s21, %s216_s20  ;;  %s348_s26 = sand.u32 7, %s2338_s24 }
  0x36   :  { %119 = vmatprep.subr.mxu0 %v2774_v11  ;;  %251 = vmatprep.subr.mxu1 %v2774_v11  ;;  %s220_s23 = scalar_lea.vmem [#allocation4], %s219_s22  ;;  %s2411_s0 = sshll.u32 %s345_s25, 4 }
  0x37   :  { %120 = vmatpush1.msra.mxu0 %v2778_v12  ;;  %252 = vmatpush1.msra.mxu1 %v2778_v12  ;;  %v221_v49 = vld [vmem:[%s220_s23] ss:$8 sm:$0x3]  ;;  %s351_s27 = sadd.s32 %s2411_s0, %s348_s26  ;;  %s477_s30 = sshra.s32 %s2343_s29, 3 }
  0x38   :  { %121 = vmatprep.subr.mxu0 %v2782_v13  ;;  %253 = vmatprep.subr.mxu1 %v2782_v13  ;;  %s352_s28 = scalar_lea.vmem [#allocation4], %s351_s27  ;;  %s480_s6 = sand.u32 7, %s2343_s29 }
  0x39   :  { %122 = vmatpush1.msra.mxu0 %v2786_v14  ;;  %254 = vmatpush1.msra.mxu1 %v2786_v14  ;;  %s2412_s7 = sshll.u32 %s477_s30, 4  ;;  %s609_s10 = sshra.s32 %s2348_s2, 3 }
  0x3a   :  { %123 = vmatprep.subr.mxu0 %v2790_v15  ;;  %255 = vmatprep.subr.mxu1 %v2790_v15  ;;  %s483_s8 = sadd.s32 %s2412_s7, %s480_s6  ;;  %s612_s11 = sand.u32 7, %s2348_s2 }
  0x3b   :  { %124 = vmatpush1.msra.mxu0 %v2794_v16  ;;  %256 = vmatpush1.msra.mxu1 %v2794_v16  ;;  %s484_s9 = scalar_lea.vmem [#allocation4], %s483_s8  ;;  %s2413_s12 = sshll.u32 %s609_s10, 4 }
  0x3c   :  { %158 = vmatmul.mubr.f32.vlgmr.msra.gmra.mxu0 %v2691_v0  ;;  %373 = vmatprep.subr.mxu0 %v2739_v1  ;;  %s615_s1 = sadd.s32 %s2413_s12, %s612_s11  ;;  %s2353_s13 = sld [smem:[#allocation3 + $0x5]] }
  0x3d   :  { %374 = vmatpush1.msra.mxu0 %v2741_v2  ;;  %421 = vmatprep.mubr.f32.mxu0 %v2691_v0  ;;  %s616_s3 = scalar_lea.vmem [#allocation4], %s615_s1  ;;  %s2358_s20 = sld [smem:[#allocation3 + $0x6]] }
  0x3e   :  { %375 = vmatprep.subr.mxu0 %v2743_v3  ;;  %505 = vmatprep.subr.mxu1 %v2739_v1  ;;  %s2363_s26 = sld [smem:[#allocation3 + $0x7]] }
  0x3f   :  { %376 = vmatpush1.msra.mxu0 %v2746_v4  ;;  %s2368_s6 = sld [smem:[#allocation3 + $0x8]] }
  0x40   :  { %377 = vmatprep.subr.mxu0 %v2750_v5  ;;  %s2373_s11 = sld [smem:[#allocation3 + $0x9]] }
  0x41   :  { %378 = vmatpush1.msra.mxu0 %v2754_v6 }
  0x42   :  { %379 = vmatprep.subr.mxu0 %v2758_v7  ;;  %s741_s14 = sshra.s32 %s2353_s13, 3  ;;  %s744_s15 = sand.u32 7, %s2353_s13 }
  0x43   :  { %380 = vmatpush1.msra.mxu0 %v2762_v8  ;;  %s2414_s16 = sshll.u32 %s741_s14, 4  ;;  %s873_s21 = sshra.s32 %s2358_s20, 3 }
  0x44   :  { %381 = vmatprep.subr.mxu0 %v2766_v9  ;;  %s747_s18 = sadd.s32 %s2414_s16, %s744_s15  ;;  %s876_s22 = sand.u32 7, %s2358_s20 }
  0x45   :  { %382 = vmatpush1.msra.mxu0 %v2770_v10  ;;  %s748_s19 = scalar_lea.vmem [#allocation4], %s747_s18  ;;  %s2415_s23 = sshll.u32 %s873_s21, 4 }
  0x46   :  { %383 = vmatprep.subr.mxu0 %v2774_v11  ;;  %s879_s24 = sadd.s32 %s2415_s23, %s876_s22  ;;  %s1005_s0 = sshra.s32 %s2363_s26, 3 }
  0x47   :  { %384 = vmatpush1.msra.mxu0 %v2778_v12  ;;  %s880_s25 = scalar_lea.vmem [#allocation4], %s879_s24  ;;  %s1008_s27 = sand.u32 7, %s2363_s26 }
  0x48   :  { %385 = vmatprep.subr.mxu0 %v2782_v13  ;;  %s1137_s7 = sshra.s32 %s2368_s6, 3  ;;  %s1140_s8 = sand.u32 7, %s2368_s6 }
  0x49   :  { %386 = vmatpush1.msra.mxu0 %v2786_v14  ;;  %s1269_s12 = sshra.s32 %s2373_s11, 3  ;;  %s1272_s1 = sand.u32 7, %s2373_s11 }
  0x4a   :  { %387 = vmatprep.subr.mxu0 %v2790_v15  ;;  %s2378_s15 = sld [smem:[#allocation3 + $0xa]] }
  0x4b   :  { %388 = vmatpush1.msra.mxu0 %v2794_v16  ;;  %s2383_s22 = sld [smem:[#allocation3 + $0xb]] }
  0x4c   :  { %637 = vmatprep.subr.mxu0 %v2739_v1 }
  0x50   :  { %s1401_s16 = sshra.s32 %s2378_s15, 3  ;;  %s1404_s18 = sand.u32 7, %s2378_s15 }
  0x51   :  { %s1533_s23 = sshra.s32 %s2383_s22, 3  ;;  %s1536_s24 = sand.u32 7, %s2383_s22 }
  0xfc   :  { %v159_v22 = vpop.f32.mrf.mxu0 }
  0xfe   :  { %v161_v24 = vpop.f32.mrf.mxu0 }
  0xff   :  { %v166_v25 = vcombine.low %v159_v22, %v161_v24 }
 0x101   :  { %v173_v26 = vrot.slane %v166_v25, %v2823_v23  ;;  %v353_v25 = vld [vmem:[%s352_s28] ss:$8 sm:$0x3]  ;;  %s2416_s28 = sshll.u32 %s1005_s0, 4 }
 0x102   :  { %s1011_s29 = sadd.s32 %s2416_s28, %s1008_s27  ;;  %s2388_s27 = sld [smem:[#allocation3 + $0xc]] }
 0x103   :  { %v180_v28 = vrot.slane %v173_v26, %v2823_v23  ;;  %s1012_s30 = scalar_lea.vmem [#allocation4], %s1011_s29 }
 0x105   :  { %v182_v29 = vadd.f32 %v180_v28, %v88_v27 }
 0x107   :  { %v2332_v30 = vmul.f32 -1.442695, %v182_v29  ;;  %v190_v31 = vrot.slane %v182_v29, 1 }
 0x108   :  { %s1665_s28 = sshra.s32 %s2388_s27, 3  ;;  %s1668_s29 = sand.u32 7, %s2388_s27 }
 0x109   :  { %2465 = vpow2.f32 %v2332_v30 }
 0x10a   :  { %2467 = vtanh.f32 %v190_v31 }
 0x116   :  { %v2466_v32 = vpop.eup %2465 }
 0x117   :  { %v186_v33 = vadd.f32 1.0, %v2466_v32  ;;  %v2468_v34 = vpop.eup %2467 }
 0x119   :  { %2469 = vrcp.f32 %v186_v33 }
 0x126   :  { %v2470_v35 = vpop.eup %2469 }
 0x127   :  { %v194_v36 = vmul.f32 %v2470_v35, %v2468_v34  ;;  %v193_v37 = vmul.f32 0.0, %v2470_v35 }
 0x129   :  { %196 = vrot.lane.b32.xlu0 %v194_v36, %s2693_s17 }
 0x12d   :  { %202 = vrot.lane.b32.xlu0 %v2470_v35, %s2693_s17 }
 0x19b   :  { %v197_v38 = vpop.permute.xlu0 %196 }
 0x19c   :  { %v199_v39 = vadd.f32 %v197_v38, %v193_v37 }
 0x19e   :  { %2471 = vtanh.f32 %v199_v39 }
 0x19f   :  { %v203_v41 = vpop.permute.xlu0 %202 }
 0x1a0   :  { %v204_v42 = vrot.slane %v203_v41, 1 }
 0x1ab   :  { %v2472_v40 = vpop.eup %2471 }
 0x1ac   :  { %207 = vrot.lane.b32.xlu1 %v2472_v40, %s2693_s17 }
 0x21e   :  { %v208_v43 = vpop.permute.xlu1 %207 }
 0x21f   :  { %v2830_v44 = vmul.f32 %v208_v43, %v204_v42 }
 0x221   :  { %2336 = vmatmul.mubr.msk.f32.vlgmr.msra.gmra.mxu1 %vm89_vm0, %v2830_v44 }
 0x222   :  { %506 = vmatpush1.msra.mxu1 %v2741_v2  ;;  %553 = vmatprep.mubr.f32.mxu1 %v2691_v0 }
 0x223   :  { %507 = vmatprep.subr.mxu1 %v2743_v3 }
 0x224   :  { %508 = vmatpush1.msra.mxu1 %v2746_v4 }
 0x225   :  { %509 = vmatprep.subr.mxu1 %v2750_v5 }
 0x226   :  { %510 = vmatpush1.msra.mxu1 %v2754_v6 }
 0x227   :  { %511 = vmatprep.subr.mxu1 %v2758_v7 }
 0x228   :  { %512 = vmatpush1.msra.mxu1 %v2762_v8 }
 0x229   :  { %513 = vmatprep.subr.mxu1 %v2766_v9 }
 0x22a   :  { %514 = vmatpush1.msra.mxu1 %v2770_v10 }
 0x22b   :  { %515 = vmatprep.subr.mxu1 %v2774_v11 }
 0x22c   :  { %516 = vmatpush1.msra.mxu1 %v2778_v12 }
 0x22d   :  { %517 = vmatprep.subr.mxu1 %v2782_v13 }
 0x22e   :  { %518 = vmatpush1.msra.mxu1 %v2786_v14 }
 0x22f   :  { %519 = vmatprep.subr.mxu1 %v2790_v15 }
 0x230   :  { %520 = vmatpush1.msra.mxu1 %v2794_v16 }
 0x231   :  { %769 = vmatprep.subr.mxu1 %v2739_v1 }
 0x2e1   :  { %v291_v45 = vpop.f32.mrf.mxu1 }
 0x2e3   :  { %v293_v46 = vpop.f32.mrf.mxu1 }
 0x2e4   :  { %v298_v47 = vcombine.low %v291_v45, %v293_v46 }
 0x2e6   :  { %v305_v48 = vrot.slane %v298_v47, %v2823_v23 }
 0x2e8   :  { %v312_v50 = vrot.slane %v305_v48, %v2823_v23 }
 0x2ea   :  { %v314_v51 = vadd.f32 %v312_v50, %v221_v49  ;;  %v485_v49 = vld [vmem:[%s484_s9] ss:$8 sm:$0x3]  ;;  %s2417_s9 = sshll.u32 %s1137_s7, 4 }
 0x2eb   :  { %s1143_s2 = sadd.s32 %s2417_s9, %s1140_s8  ;;  %s2393_s8 = sld [smem:[#allocation3 + $0xd]] }
 0x2ec   :  { %v2337_v52 = vmul.f32 -1.442695, %v314_v51  ;;  %v322_v53 = vrot.slane %v314_v51, 1  ;;  %s1144_s10 = scalar_lea.vmem [#allocation4], %s1143_s2 }
 0x2ee   :  { %2473 = vpow2.f32 %v2337_v52 }
 0x2ef   :  { %2475 = vtanh.f32 %v322_v53 }
 0x2f1   :  { %s1797_s9 = sshra.s32 %s2393_s8, 3  ;;  %s1800_s2 = sand.u32 7, %s2393_s8 }
 0x2fb   :  { %v2474_v54 = vpop.eup %2473 }
 0x2fc   :  { %v318_v55 = vadd.f32 1.0, %v2474_v54  ;;  %v2476_v56 = vpop.eup %2475 }
 0x2fe   :  { %2477 = vrcp.f32 %v318_v55 }
 0x30b   :  { %v2478_v57 = vpop.eup %2477 }
 0x30c   :  { %334 = vrot.lane.b32.xlu0 %v2478_v57, %s2693_s17  ;;  %v326_v58 = vmul.f32 %v2478_v57, %v2476_v56  ;;  %v325_v59 = vmul.f32 %v2478_v57, %v199_v39 }
 0x30e   :  { %328 = vrot.lane.b32.xlu1 %v326_v58, %s2693_s17 }
 0x37e   :  { %v335_v63 = vpop.permute.xlu0 %334 }
 0x37f   :  { %v336_v17 = vrot.slane %v335_v63, 1 }
 0x380   :  { %v329_v60 = vpop.permute.xlu1 %328 }
 0x381   :  { %v331_v61 = vadd.f32 %v329_v60, %v325_v59 }
 0x383   :  { %2479 = vtanh.f32 %v331_v61 }
 0x390   :  { %v2480_v62 = vpop.eup %2479 }
 0x391   :  { %339 = vrot.lane.b32.xlu1 %v2480_v62, %s2693_s17 }
 0x403   :  { %v340_v18 = vpop.permute.xlu1 %339 }
 0x404   :  { %v342_v19 = vmul.f32 %v340_v18, %v336_v17 }
 0x406   :  { %2341 = vmatmul.mubr.msk.f32.vlgmr.msra.gmra.mxu0 %vm89_vm0, %v342_v19  ;;  %v343_v42 = vadd.f32 %v342_v19, %v2830_v44 }
 0x407   :  { %638 = vmatpush1.msra.mxu0 %v2741_v2  ;;  %685 = vmatprep.mubr.f32.mxu0 %v2691_v0 }
 0x408   :  { %639 = vmatprep.subr.mxu0 %v2743_v3 }
 0x409   :  { %640 = vmatpush1.msra.mxu0 %v2746_v4 }
 0x40a   :  { %641 = vmatprep.subr.mxu0 %v2750_v5 }
 0x40b   :  { %642 = vmatpush1.msra.mxu0 %v2754_v6 }
 0x40c   :  { %643 = vmatprep.subr.mxu0 %v2758_v7 }
 0x40d   :  { %644 = vmatpush1.msra.mxu0 %v2762_v8 }
 0x40e   :  { %645 = vmatprep.subr.mxu0 %v2766_v9 }
 0x40f   :  { %646 = vmatpush1.msra.mxu0 %v2770_v10 }
 0x410   :  { %647 = vmatprep.subr.mxu0 %v2774_v11 }
 0x411   :  { %648 = vmatpush1.msra.mxu0 %v2778_v12 }
 0x412   :  { %649 = vmatprep.subr.mxu0 %v2782_v13 }
 0x413   :  { %650 = vmatpush1.msra.mxu0 %v2786_v14 }
 0x414   :  { %651 = vmatprep.subr.mxu0 %v2790_v15 }
 0x415   :  { %652 = vmatpush1.msra.mxu0 %v2794_v16 }
 0x416   :  { %901 = vmatprep.subr.mxu0 %v2739_v1 }
 0x4c6   :  { %v423_v20 = vpop.f32.mrf.mxu0 }
 0x4c8   :  { %v425_v21 = vpop.f32.mrf.mxu0 }
 0x4c9   :  { %v430_v22 = vcombine.low %v423_v20, %v425_v21 }
 0x4cb   :  { %v437_v24 = vrot.slane %v430_v22, %v2823_v23 }
 0x4cd   :  { %v444_v26 = vrot.slane %v437_v24, %v2823_v23 }
 0x4cf   :  { %v446_v27 = vadd.f32 %v444_v26, %v353_v25  ;;  %v617_v26 = vld [vmem:[%s616_s3] ss:$8 sm:$0x3]  ;;  %s2418_s3 = sshll.u32 %s1269_s12, 4 }
 0x4d0   :  { %s1275_s13 = sadd.s32 %s2418_s3, %s1272_s1  ;;  %s2398_s1 = sld [smem:[#allocation3 + $0xe]] }
 0x4d1   :  { %v2342_v28 = vmul.f32 -1.442695, %v446_v27  ;;  %v454_v29 = vrot.slane %v446_v27, 1  ;;  %s1276_s14 = scalar_lea.vmem [#allocation4], %s1275_s13 }
 0x4d3   :  { %2481 = vpow2.f32 %v2342_v28 }
 0x4d4   :  { %2483 = vtanh.f32 %v454_v29 }
 0x4d6   :  { %s1929_s3 = sshra.s32 %s2398_s1, 3  ;;  %s1932_s13 = sand.u32 7, %s2398_s1 }
 0x4e0   :  { %v2482_v30 = vpop.eup %2481 }
 0x4e1   :  { %v450_v31 = vadd.f32 1.0, %v2482_v30  ;;  %v2484_v32 = vpop.eup %2483 }
 0x4e3   :  { %2485 = vrcp.f32 %v450_v31 }
 0x4f0   :  { %v2486_v33 = vpop.eup %2485 }
 0x4f1   :  { %466 = vrot.lane.b32.xlu1 %v2486_v33, %s2693_s17  ;;  %v458_v34 = vmul.f32 %v2486_v33, %v2484_v32  ;;  %v457_v35 = vmul.f32 %v2486_v33, %v331_v61 }
 0x4f3   :  { %460 = vrot.lane.b32.xlu0 %v458_v34, %s2693_s17 }
 0x563   :  { %v467_v39 = vpop.permute.xlu1 %466 }
 0x564   :  { %v468_v40 = vrot.slane %v467_v39, 1 }
 0x565   :  { %v461_v36 = vpop.permute.xlu0 %460 }
 0x566   :  { %v463_v37 = vadd.f32 %v461_v36, %v457_v35 }
 0x568   :  { %2487 = vtanh.f32 %v463_v37 }
 0x575   :  { %v2488_v38 = vpop.eup %2487 }
 0x576   :  { %471 = vrot.lane.b32.xlu0 %v2488_v38, %s2693_s17 }
 0x5e8   :  { %v472_v41 = vpop.permute.xlu0 %471 }
 0x5e9   :  { %v474_v43 = vmul.f32 %v472_v41, %v468_v40 }
 0x5eb   :  { %v475_v45 = vadd.f32 %v474_v43, %v343_v42  ;;  %2346 = vmatmul.mubr.msk.f32.vlgmr.msra.gmra.mxu1 %vm89_vm0, %v474_v43 }
 0x5ec   :  { %770 = vmatpush1.msra.mxu1 %v2741_v2  ;;  %817 = vmatprep.mubr.f32.mxu1 %v2691_v0 }
 0x5ed   :  { %771 = vmatprep.subr.mxu1 %v2743_v3 }
 0x5ee   :  { %772 = vmatpush1.msra.mxu1 %v2746_v4 }
 0x5ef   :  { %773 = vmatprep.subr.mxu1 %v2750_v5 }
 0x5f0   :  { %774 = vmatpush1.msra.mxu1 %v2754_v6 }
 0x5f1   :  { %775 = vmatprep.subr.mxu1 %v2758_v7 }
 0x5f2   :  { %776 = vmatpush1.msra.mxu1 %v2762_v8 }
 0x5f3   :  { %777 = vmatprep.subr.mxu1 %v2766_v9 }
 0x5f4   :  { %778 = vmatpush1.msra.mxu1 %v2770_v10 }
 0x5f5   :  { %779 = vmatprep.subr.mxu1 %v2774_v11 }
 0x5f6   :  { %780 = vmatpush1.msra.mxu1 %v2778_v12 }
 0x5f7   :  { %781 = vmatprep.subr.mxu1 %v2782_v13 }
 0x5f8   :  { %782 = vmatpush1.msra.mxu1 %v2786_v14 }
 0x5f9   :  { %783 = vmatprep.subr.mxu1 %v2790_v15 }
 0x5fa   :  { %784 = vmatpush1.msra.mxu1 %v2794_v16 }
 0x5fb   :  { %1033 = vmatprep.subr.mxu1 %v2739_v1 }
 0x6ab   :  { %v555_v44 = vpop.f32.mrf.mxu1 }
 0x6ad   :  { %v557_v46 = vpop.f32.mrf.mxu1 }
 0x6ae   :  { %v562_v47 = vcombine.low %v555_v44, %v557_v46 }
 0x6b0   :  { %v569_v48 = vrot.slane %v562_v47, %v2823_v23 }
 0x6b2   :  { %v576_v50 = vrot.slane %v569_v48, %v2823_v23 }
 0x6b4   :  { %v578_v51 = vadd.f32 %v576_v50, %v485_v49  ;;  %v749_v49 = vld [vmem:[%s748_s19] ss:$8 sm:$0x3]  ;;  %s2419_s19 = sshll.u32 %s1401_s16, 4 }
 0x6b5   :  { %s1407_s20 = sadd.s32 %s2419_s19, %s1404_s18  ;;  %s2403_s18 = sld [smem:[#allocation3 + $0xf]] }
 0x6b6   :  { %v2347_v52 = vmul.f32 -1.442695, %v578_v51  ;;  %v586_v53 = vrot.slane %v578_v51, 1  ;;  %s1408_s21 = scalar_lea.vmem [#allocation4], %s1407_s20 }
 0x6b8   :  { %2489 = vpow2.f32 %v2347_v52 }
 0x6b9   :  { %2491 = vtanh.f32 %v586_v53 }
 0x6bb   :  { %s2061_s19 = sshra.s32 %s2403_s18, 3  ;;  %s2064_s20 = sand.u32 7, %s2403_s18 }
 0x6c5   :  { %v2490_v54 = vpop.eup %2489 }
 0x6c6   :  { %v582_v55 = vadd.f32 1.0, %v2490_v54  ;;  %v2492_v56 = vpop.eup %2491 }
 0x6c8   :  { %2493 = vrcp.f32 %v582_v55 }
 0x6d5   :  { %v2494_v57 = vpop.eup %2493 }
 0x6d6   :  { %598 = vrot.lane.b32.xlu0 %v2494_v57, %s2693_s17  ;;  %v590_v58 = vmul.f32 %v2494_v57, %v2492_v56  ;;  %v589_v59 = vmul.f32 %v2494_v57, %v463_v37 }
 0x6d8   :  { %592 = vrot.lane.b32.xlu1 %v590_v58, %s2693_s17 }
 0x748   :  { %v599_v63 = vpop.permute.xlu0 %598 }
 0x749   :  { %v600_v17 = vrot.slane %v599_v63, 1 }
 0x74a   :  { %v593_v60 = vpop.permute.xlu1 %592 }
 0x74b   :  { %v595_v61 = vadd.f32 %v593_v60, %v589_v59 }
 0x74d   :  { %2495 = vtanh.f32 %v595_v61 }
 0x75a   :  { %v2496_v62 = vpop.eup %2495 }
 0x75b   :  { %603 = vrot.lane.b32.xlu1 %v2496_v62, %s2693_s17 }
 0x7cd   :  { %v604_v18 = vpop.permute.xlu1 %603 }
 0x7ce   :  { %v606_v19 = vmul.f32 %v604_v18, %v600_v17 }
 0x7d0   :  { %v607_v20 = vadd.f32 %v606_v19, %v475_v45  ;;  %2351 = vmatmul.mubr.msk.f32.vlgmr.msra.gmra.mxu0 %vm89_vm0, %v606_v19 }
 0x7d1   :  { %902 = vmatpush1.msra.mxu0 %v2741_v2  ;;  %949 = vmatprep.mubr.f32.mxu0 %v2691_v0 }
 0x7d2   :  { %903 = vmatprep.subr.mxu0 %v2743_v3 }
 0x7d3   :  { %904 = vmatpush1.msra.mxu0 %v2746_v4 }
 0x7d4   :  { %905 = vmatprep.subr.mxu0 %v2750_v5 }
 0x7d5   :  { %906 = vmatpush1.msra.mxu0 %v2754_v6 }
 0x7d6   :  { %907 = vmatprep.subr.mxu0 %v2758_v7 }
 0x7d7   :  { %908 = vmatpush1.msra.mxu0 %v2762_v8 }
 0x7d8   :  { %909 = vmatprep.subr.mxu0 %v2766_v9 }
 0x7d9   :  { %910 = vmatpush1.msra.mxu0 %v2770_v10 }
 0x7da   :  { %911 = vmatprep.subr.mxu0 %v2774_v11 }
 0x7db   :  { %912 = vmatpush1.msra.mxu0 %v2778_v12 }
 0x7dc   :  { %913 = vmatprep.subr.mxu0 %v2782_v13 }
 0x7dd   :  { %914 = vmatpush1.msra.mxu0 %v2786_v14 }
 0x7de   :  { %915 = vmatprep.subr.mxu0 %v2790_v15 }
 0x7df   :  { %916 = vmatpush1.msra.mxu0 %v2794_v16 }
 0x7e0   :  { %1165 = vmatprep.subr.mxu0 %v2739_v1 }
 0x890   :  { %v687_v21 = vpop.f32.mrf.mxu0 }
 0x892   :  { %v689_v22 = vpop.f32.mrf.mxu0 }
 0x893   :  { %v694_v24 = vcombine.low %v687_v21, %v689_v22 }
 0x895   :  { %v701_v25 = vrot.slane %v694_v24, %v2823_v23 }
 0x897   :  { %v708_v27 = vrot.slane %v701_v25, %v2823_v23 }
 0x899   :  { %v710_v28 = vadd.f32 %v708_v27, %v617_v26  ;;  %v881_v26 = vld [vmem:[%s880_s25] ss:$8 sm:$0x3]  ;;  %s2420_s25 = sshll.u32 %s1533_s23, 4 }
 0x89a   :  { %s1539_s26 = sadd.s32 %s2420_s25, %s1536_s24 }
 0x89b   :  { %v2352_v29 = vmul.f32 -1.442695, %v710_v28  ;;  %v718_v30 = vrot.slane %v710_v28, 1  ;;  %s1540_s0 = scalar_lea.vmem [#allocation4], %s1539_s26 }
 0x89d   :  { %2497 = vpow2.f32 %v2352_v29 }
 0x89e   :  { %2499 = vtanh.f32 %v718_v30 }
 0x8aa   :  { %v2498_v31 = vpop.eup %2497 }
 0x8ab   :  { %v714_v32 = vadd.f32 1.0, %v2498_v31  ;;  %v2500_v33 = vpop.eup %2499 }
 0x8ad   :  { %2501 = vrcp.f32 %v714_v32 }
 0x8ba   :  { %v2502_v34 = vpop.eup %2501 }
 0x8bb   :  { %730 = vrot.lane.b32.xlu1 %v2502_v34, %s2693_s17  ;;  %v722_v35 = vmul.f32 %v2502_v34, %v2500_v33  ;;  %v721_v36 = vmul.f32 %v2502_v34, %v595_v61 }
 0x8bd   :  { %724 = vrot.lane.b32.xlu0 %v722_v35, %s2693_s17 }
 0x92d   :  { %v731_v40 = vpop.permute.xlu1 %730 }
 0x92e   :  { %v732_v41 = vrot.slane %v731_v40, 1 }
 0x92f   :  { %v725_v37 = vpop.permute.xlu0 %724 }
 0x930   :  { %v727_v38 = vadd.f32 %v725_v37, %v721_v36 }
 0x932   :  { %2503 = vtanh.f32 %v727_v38 }
 0x93f   :  { %v2504_v39 = vpop.eup %2503 }
 0x940   :  { %735 = vrot.lane.b32.xlu0 %v2504_v39, %s2693_s17 }
 0x9b2   :  { %v736_v42 = vpop.permute.xlu0 %735 }
 0x9b3   :  { %v738_v43 = vmul.f32 %v736_v42, %v732_v41 }
 0x9b5   :  { %v739_v45 = vadd.f32 %v738_v43, %v607_v20  ;;  %2356 = vmatmul.mubr.msk.f32.vlgmr.msra.gmra.mxu1 %vm89_vm0, %v738_v43 }
 0x9b6   :  { %1034 = vmatpush1.msra.mxu1 %v2741_v2  ;;  %1081 = vmatprep.mubr.f32.mxu1 %v2691_v0 }
 0x9b7   :  { %1035 = vmatprep.subr.mxu1 %v2743_v3 }
 0x9b8   :  { %1036 = vmatpush1.msra.mxu1 %v2746_v4 }
 0x9b9   :  { %1037 = vmatprep.subr.mxu1 %v2750_v5 }
 0x9ba   :  { %1038 = vmatpush1.msra.mxu1 %v2754_v6 }
 0x9bb   :  { %1039 = vmatprep.subr.mxu1 %v2758_v7 }
 0x9bc   :  { %1040 = vmatpush1.msra.mxu1 %v2762_v8 }
 0x9bd   :  { %1041 = vmatprep.subr.mxu1 %v2766_v9 }
 0x9be   :  { %1042 = vmatpush1.msra.mxu1 %v2770_v10 }
 0x9bf   :  { %1043 = vmatprep.subr.mxu1 %v2774_v11 }
 0x9c0   :  { %1044 = vmatpush1.msra.mxu1 %v2778_v12 }
 0x9c1   :  { %1045 = vmatprep.subr.mxu1 %v2782_v13 }
 0x9c2   :  { %1046 = vmatpush1.msra.mxu1 %v2786_v14 }
 0x9c3   :  { %1047 = vmatprep.subr.mxu1 %v2790_v15 }
 0x9c4   :  { %1048 = vmatpush1.msra.mxu1 %v2794_v16 }
 0x9c5   :  { %1297 = vmatprep.subr.mxu1 %v2739_v1 }
 0xa75   :  { %v819_v44 = vpop.f32.mrf.mxu1 }
 0xa77   :  { %v821_v46 = vpop.f32.mrf.mxu1 }
 0xa78   :  { %v826_v47 = vcombine.low %v819_v44, %v821_v46 }
 0xa7a   :  { %v833_v48 = vrot.slane %v826_v47, %v2823_v23 }
 0xa7c   :  { %v840_v50 = vrot.slane %v833_v48, %v2823_v23 }
 0xa7e   :  { %v842_v51 = vadd.f32 %v840_v50, %v749_v49  ;;  %v1013_v49 = vld [vmem:[%s1012_s30] ss:$8 sm:$0x3]  ;;  %s2421_s30 = sshll.u32 %s1665_s28, 4 }
 0xa7f   :  { %s1671_s6 = sadd.s32 %s2421_s30, %s1668_s29 }
 0xa80   :  { %v2357_v52 = vmul.f32 -1.442695, %v842_v51  ;;  %v850_v53 = vrot.slane %v842_v51, 1  ;;  %s1672_s7 = scalar_lea.vmem [#allocation4], %s1671_s6 }
 0xa82   :  { %2505 = vpow2.f32 %v2357_v52 }
 0xa83   :  { %2507 = vtanh.f32 %v850_v53 }
 0xa8f   :  { %v2506_v54 = vpop.eup %2505 }
 0xa90   :  { %v846_v55 = vadd.f32 1.0, %v2506_v54  ;;  %v2508_v56 = vpop.eup %2507 }
 0xa92   :  { %2509 = vrcp.f32 %v846_v55 }
 0xa9f   :  { %v2510_v57 = vpop.eup %2509 }
 0xaa0   :  { %862 = vrot.lane.b32.xlu0 %v2510_v57, %s2693_s17  ;;  %v854_v58 = vmul.f32 %v2510_v57, %v2508_v56  ;;  %v853_v59 = vmul.f32 %v2510_v57, %v727_v38 }
 0xaa2   :  { %856 = vrot.lane.b32.xlu1 %v854_v58, %s2693_s17 }
 0xb12   :  { %v863_v63 = vpop.permute.xlu0 %862 }
 0xb13   :  { %v864_v17 = vrot.slane %v863_v63, 1 }
 0xb14   :  { %v857_v60 = vpop.permute.xlu1 %856 }
 0xb15   :  { %v859_v61 = vadd.f32 %v857_v60, %v853_v59 }
 0xb17   :  { %2511 = vtanh.f32 %v859_v61 }
 0xb24   :  { %v2512_v62 = vpop.eup %2511 }
 0xb25   :  { %867 = vrot.lane.b32.xlu1 %v2512_v62, %s2693_s17 }
 0xb97   :  { %v868_v18 = vpop.permute.xlu1 %867 }
 0xb98   :  { %v870_v19 = vmul.f32 %v868_v18, %v864_v17 }
 0xb9a   :  { %v871_v20 = vadd.f32 %v870_v19, %v739_v45  ;;  %2361 = vmatmul.mubr.msk.f32.vlgmr.msra.gmra.mxu0 %vm89_vm0, %v870_v19 }
 0xb9b   :  { %1166 = vmatpush1.msra.mxu0 %v2741_v2  ;;  %1213 = vmatprep.mubr.f32.mxu0 %v2691_v0 }
 0xb9c   :  { %1167 = vmatprep.subr.mxu0 %v2743_v3 }
 0xb9d   :  { %1168 = vmatpush1.msra.mxu0 %v2746_v4 }
 0xb9e   :  { %1169 = vmatprep.subr.mxu0 %v2750_v5 }
 0xb9f   :  { %1170 = vmatpush1.msra.mxu0 %v2754_v6 }
 0xba0   :  { %1171 = vmatprep.subr.mxu0 %v2758_v7 }
 0xba1   :  { %1172 = vmatpush1.msra.mxu0 %v2762_v8 }
 0xba2   :  { %1173 = vmatprep.subr.mxu0 %v2766_v9 }
 0xba3   :  { %1174 = vmatpush1.msra.mxu0 %v2770_v10 }
 0xba4   :  { %1175 = vmatprep.subr.mxu0 %v2774_v11 }
 0xba5   :  { %1176 = vmatpush1.msra.mxu0 %v2778_v12 }
 0xba6   :  { %1177 = vmatprep.subr.mxu0 %v2782_v13 }
 0xba7   :  { %1178 = vmatpush1.msra.mxu0 %v2786_v14 }
 0xba8   :  { %1179 = vmatprep.subr.mxu0 %v2790_v15 }
 0xba9   :  { %1180 = vmatpush1.msra.mxu0 %v2794_v16 }
 0xbaa   :  { %1429 = vmatprep.subr.mxu0 %v2739_v1 }
 0xc5a   :  { %v951_v21 = vpop.f32.mrf.mxu0 }
 0xc5c   :  { %v953_v22 = vpop.f32.mrf.mxu0 }
 0xc5d   :  { %v958_v24 = vcombine.low %v951_v21, %v953_v22 }
 0xc5f   :  { %v965_v25 = vrot.slane %v958_v24, %v2823_v23 }
 0xc61   :  { %v972_v27 = vrot.slane %v965_v25, %v2823_v23 }
 0xc63   :  { %v974_v28 = vadd.f32 %v972_v27, %v881_v26 }
 0xc65   :  { %v2362_v29 = vmul.f32 -1.442695, %v974_v28  ;;  %v982_v30 = vrot.slane %v974_v28, 1 }
 0xc67   :  { %2513 = vpow2.f32 %v2362_v29  ;;  %v3024_v29 = vld [vmem:[#allocation6 + $0x70] sm:$0xff] }
 0xc68   :  { %2515 = vtanh.f32 %v982_v30  ;;  %v3028_v30 = vld [vmem:[#allocation6 + $0x68] sm:$0xff] }
 0xc74   :  { %v2514_v31 = vpop.eup %2513 }
 0xc75   :  { %v978_v32 = vadd.f32 1.0, %v2514_v31  ;;  %v2516_v33 = vpop.eup %2515  ;;  %v3031_v31 = vld [vmem:[#allocation6 + $0x60] sm:$0xff] }
 0xc77   :  { %2517 = vrcp.f32 %v978_v32  ;;  %v3034_v32 = vld [vmem:[#allocation6 + $0x58] sm:$0xff] }
 0xc84   :  { %v2518_v34 = vpop.eup %2517 }
 0xc85   :  { %994 = vrot.lane.b32.xlu1 %v2518_v34, %s2693_s17  ;;  %v986_v35 = vmul.f32 %v2518_v34, %v2516_v33  ;;  %v985_v36 = vmul.f32 %v2518_v34, %v859_v61  ;;  %v3037_v33 = vld [vmem:[#allocation6 + $0x50] sm:$0xff]  ;;  %v3040_v34 = vld [vmem:[#allocation6 + $0x48] sm:$0xff] }
 0xc87   :  { %988 = vrot.lane.b32.xlu0 %v986_v35, %s2693_s17  ;;  %v3043_v35 = vld [vmem:[#allocation6 + $0x40] sm:$0xff] }
 0xcf7   :  { %v995_v40 = vpop.permute.xlu1 %994 }
 0xcf8   :  { %v996_v41 = vrot.slane %v995_v40, 1  ;;  %v3058_v40 = vld [vmem:[#allocation6 + $0x18] sm:$0xff] }
 0xcf9   :  { %v989_v37 = vpop.permute.xlu0 %988 }
 0xcfa   :  { %v991_v38 = vadd.f32 %v989_v37, %v985_v36  ;;  %v3046_v36 = vld [vmem:[#allocation6 + $0x38] sm:$0xff]  ;;  %v3049_v37 = vld [vmem:[#allocation6 + $0x30] sm:$0xff] }
 0xcfc   :  { %2519 = vtanh.f32 %v991_v38 }
 0xd09   :  { %v2520_v39 = vpop.eup %2519 }
 0xd0a   :  { %999 = vrot.lane.b32.xlu0 %v2520_v39, %s2693_s17  ;;  %v3055_v39 = vld [vmem:[#allocation6 + $0x20] sm:$0xff] }
 0xd7c   :  { %v1000_v42 = vpop.permute.xlu0 %999 }
 0xd7d   :  { %v1002_v43 = vmul.f32 %v1000_v42, %v996_v41  ;;  %v3061_v41 = vld [vmem:[#allocation6 + $0x10] sm:$0xff]  ;;  %v3064_v42 = vld [vmem:[#allocation6 + $0x8] sm:$0xff] }
 0xd7f   :  { %v1003_v45 = vadd.f32 %v1002_v43, %v871_v20  ;;  %2366 = vmatmul.mubr.msk.f32.vlgmr.msra.gmra.mxu1 %vm89_vm0, %v1002_v43  ;;  %v3067_v43 = vld [vmem:[#allocation6] sm:$0xff] }
 0xd80   :  { %1298 = vmatpush1.msra.mxu1 %v2741_v2  ;;  %1345 = vmatprep.mubr.f32.mxu1 %v2691_v0 }
 0xd81   :  { %1299 = vmatprep.subr.mxu1 %v2743_v3 }
 0xd82   :  { %1300 = vmatpush1.msra.mxu1 %v2746_v4 }
 0xd83   :  { %1301 = vmatprep.subr.mxu1 %v2750_v5 }
 0xd84   :  { %1302 = vmatpush1.msra.mxu1 %v2754_v6 }
 0xd85   :  { %1303 = vmatprep.subr.mxu1 %v2758_v7 }
 0xd86   :  { %1304 = vmatpush1.msra.mxu1 %v2762_v8 }
 0xd87   :  { %1305 = vmatprep.subr.mxu1 %v2766_v9 }
 0xd88   :  { %1306 = vmatpush1.msra.mxu1 %v2770_v10 }
 0xd89   :  { %1307 = vmatprep.subr.mxu1 %v2774_v11 }
 0xd8a   :  { %1308 = vmatpush1.msra.mxu1 %v2778_v12 }
 0xd8b   :  { %1309 = vmatprep.subr.mxu1 %v2782_v13 }
 0xd8c   :  { %1310 = vmatpush1.msra.mxu1 %v2786_v14 }
 0xd8d   :  { %1311 = vmatprep.subr.mxu1 %v2790_v15 }
 0xd8e   :  { %1312 = vmatpush1.msra.mxu1 %v2794_v16 }
 0xd8f   :  { %1561 = vmatprep.subr.mxu1 %v2739_v1 }
 0xe3f   :  { %v1083_v44 = vpop.f32.mrf.mxu1 }
 0xe41   :  { %v1085_v46 = vpop.f32.mrf.mxu1 }
 0xe42   :  { %v1090_v47 = vcombine.low %v1083_v44, %v1085_v46 }
 0xe44   :  { %v1097_v48 = vrot.slane %v1090_v47, %v2823_v23 }
 0xe46   :  { %v1104_v50 = vrot.slane %v1097_v48, %v2823_v23 }
 0xe48   :  { %v1106_v51 = vadd.f32 %v1104_v50, %v1013_v49  ;;  %v1277_v49 = vld [vmem:[%s1276_s14] ss:$8 sm:$0x3]  ;;  %s2423_s14 = sshll.u32 %s1929_s3, 4 }
 0xe49   :  { %s1935_s15 = sadd.s32 %s2423_s14, %s1932_s13 }
 0xe4a   :  { %v2367_v52 = vmul.f32 -1.442695, %v1106_v51  ;;  %v1114_v53 = vrot.slane %v1106_v51, 1  ;;  %s1936_s16 = scalar_lea.vmem [#allocation4], %s1935_s15 }
 0xe4c   :  { %2521 = vpow2.f32 %v2367_v52 }
 0xe4d   :  { %2523 = vtanh.f32 %v1114_v53 }
 0xe59   :  { %v2522_v54 = vpop.eup %2521 }
 0xe5a   :  { %v1110_v55 = vadd.f32 1.0, %v2522_v54  ;;  %v2524_v56 = vpop.eup %2523 }
 0xe5c   :  { %2525 = vrcp.f32 %v1110_v55 }
 0xe69   :  { %v2526_v57 = vpop.eup %2525 }
 0xe6a   :  { %1126 = vrot.lane.b32.xlu0 %v2526_v57, %s2693_s17  ;;  %v1118_v58 = vmul.f32 %v2526_v57, %v2524_v56  ;;  %v1117_v59 = vmul.f32 %v2526_v57, %v991_v38  ;;  %v3052_v38 = vld [vmem:[#allocation6 + $0x28] sm:$0xff] }
 0xe6c   :  { %1120 = vrot.lane.b32.xlu1 %v1118_v58, %s2693_s17 }
 0xedc   :  { %v1127_v63 = vpop.permute.xlu0 %1126 }
 0xedd   :  { %v1128_v17 = vrot.slane %v1127_v63, 1 }
 0xede   :  { %v1121_v60 = vpop.permute.xlu1 %1120 }
 0xedf   :  { %v1123_v61 = vadd.f32 %v1121_v60, %v1117_v59 }
 0xee1   :  { %2527 = vtanh.f32 %v1123_v61 }
 0xeee   :  { %v2528_v62 = vpop.eup %2527 }
 0xeef   :  { %1131 = vrot.lane.b32.xlu1 %v2528_v62, %s2693_s17 }
 0xf61   :  { %v1132_v18 = vpop.permute.xlu1 %1131 }
 0xf62   :  { %v1134_v19 = vmul.f32 %v1132_v18, %v1128_v17 }
 0xf64   :  { %v1135_v20 = vadd.f32 %v1134_v19, %v1003_v45  ;;  %2371 = vmatmul.mubr.msk.f32.vlgmr.msra.gmra.mxu0 %vm89_vm0, %v1134_v19  ;;  %v3070_v45 = vld [vmem:[#allocation6 + $0x78] sm:$0xff] }
 0xf65   :  { %1430 = vmatpush1.msra.mxu0 %v2741_v2  ;;  %1477 = vmatprep.mubr.f32.mxu0 %v2691_v0 }
 0xf66   :  { %1431 = vmatprep.subr.mxu0 %v2743_v3 }
 0xf67   :  { %1432 = vmatpush1.msra.mxu0 %v2746_v4 }
 0xf68   :  { %1433 = vmatprep.subr.mxu0 %v2750_v5 }
 0xf69   :  { %1434 = vmatpush1.msra.mxu0 %v2754_v6  ;;  %v1145_v6 = vld [vmem:[%s1144_s10] ss:$8 sm:$0x3]  ;;  %s2422_s10 = sshll.u32 %s1797_s9, 4 }
 0xf6a   :  { %1435 = vmatprep.subr.mxu0 %v2758_v7  ;;  %s1803_s11 = sadd.s32 %s2422_s10, %s1800_s2 }
 0xf6b   :  { %1436 = vmatpush1.msra.mxu0 %v2762_v8  ;;  %s1804_s12 = scalar_lea.vmem [#allocation4], %s1803_s11 }
 0xf6c   :  { %1437 = vmatprep.subr.mxu0 %v2766_v9 }
 0xf6d   :  { %1438 = vmatpush1.msra.mxu0 %v2770_v10 }
 0xf6e   :  { %1439 = vmatprep.subr.mxu0 %v2774_v11 }
 0xf6f   :  { %1440 = vmatpush1.msra.mxu0 %v2778_v12 }
 0xf70   :  { %1441 = vmatprep.subr.mxu0 %v2782_v13 }
 0xf71   :  { %1442 = vmatpush1.msra.mxu0 %v2786_v14 }
 0xf72   :  { %1443 = vmatprep.subr.mxu0 %v2790_v15 }
 0xf73   :  { %1444 = vmatpush1.msra.mxu0 %v2794_v16 }
 0xf74   :  { %1693 = vmatprep.subr.mxu0 %v2739_v1 }
0x1024   :  { %v1215_v2 = vpop.f32.mrf.mxu0 }
0x1026   :  { %v1217_v3 = vpop.f32.mrf.mxu0 }
0x1027   :  { %v1222_v4 = vcombine.low %v1215_v2, %v1217_v3 }
0x1029   :  { %v1229_v5 = vrot.slane %v1222_v4, %v2823_v23 }
0x102b   :  { %v1236_v7 = vrot.slane %v1229_v5, %v2823_v23 }
0x102d   :  { %v1238_v8 = vadd.f32 %v1236_v7, %v1145_v6  ;;  %v1409_v6 = vld [vmem:[%s1408_s21] ss:$8 sm:$0x3]  ;;  %s2424_s21 = sshll.u32 %s2061_s19, 4 }
0x102e   :  { %s2067_s22 = sadd.s32 %s2424_s21, %s2064_s20 }
0x102f   :  { %v2372_v9 = vmul.f32 -1.442695, %v1238_v8  ;;  %v1246_v10 = vrot.slane %v1238_v8, 1  ;;  %s2068_s23 = scalar_lea.vmem [#allocation4], %s2067_s22 }
0x1031   :  { %2529 = vpow2.f32 %v2372_v9 }
0x1032   :  { %2531 = vtanh.f32 %v1246_v10 }
0x103e   :  { %v2530_v11 = vpop.eup %2529 }
0x103f   :  { %v1242_v1 = vadd.f32 1.0, %v2530_v11  ;;  %v2532_v12 = vpop.eup %2531 }
0x1041   :  { %2533 = vrcp.f32 %v1242_v1 }
0x104e   :  { %v2534_v13 = vpop.eup %2533 }
0x104f   :  { %1258 = vrot.lane.b32.xlu1 %v2534_v13, %s2693_s17  ;;  %v1250_v14 = vmul.f32 %v2534_v13, %v2532_v12  ;;  %v1249_v15 = vmul.f32 %v2534_v13, %v1123_v61 }
0x1051   :  { %1252 = vrot.lane.b32.xlu0 %v1250_v14, %s2693_s17 }
0x10c1   :  { %v1259_v24 = vpop.permute.xlu1 %1258 }
0x10c2   :  { %v1260_v25 = vrot.slane %v1259_v24, 1 }
0x10c3   :  { %v1253_v16 = vpop.permute.xlu0 %1252 }
0x10c4   :  { %v3017_v21 = vadd.f32 %v1253_v16, %v1249_v15 }
0x10c6   :  { %2535 = vtanh.f32 %v3017_v21 }
0x10d3   :  { %v2536_v22 = vpop.eup %2535 }
0x10d4   :  { %1263 = vrot.lane.b32.xlu0 %v2536_v22, %s2693_s17 }
0x1146   :  { %v1264_v26 = vpop.permute.xlu0 %1263 }
0x1147   :  { %v1266_v27 = vmul.f32 %v1264_v26, %v1260_v25 }
0x1149   :  { %v3021_v28 = vadd.f32 %v1266_v27, %v1135_v20  ;;  %2376 = vmatmul.mubr.msk.f32.vlgmr.msra.gmra.mxu1 %vm89_vm0, %v1266_v27 }
0x114a   :  { %1562 = vmatpush1.msra.mxu1 %v3024_v29  ;;  %1609 = vmatprep.mubr.f32.mxu1 %v2691_v0 }
0x114b   :  { %1563 = vmatprep.subr.mxu1 %v3028_v30 }
0x114c   :  { %1564 = vmatpush1.msra.mxu1 %v3031_v31 }
0x114d   :  { %1565 = vmatprep.subr.mxu1 %v3034_v32 }
0x114e   :  { %1566 = vmatpush1.msra.mxu1 %v3037_v33 }
0x114f   :  { %1567 = vmatprep.subr.mxu1 %v3040_v34 }
0x1150   :  { %1568 = vmatpush1.msra.mxu1 %v3043_v35 }
0x1151   :  { %1569 = vmatprep.subr.mxu1 %v3046_v36 }
0x1152   :  { %1570 = vmatpush1.msra.mxu1 %v3049_v37 }
0x1153   :  { %1571 = vmatprep.subr.mxu1 %v3052_v38 }
0x1154   :  { %1572 = vmatpush1.msra.mxu1 %v3055_v39 }
0x1155   :  { %1573 = vmatprep.subr.mxu1 %v3058_v40 }
0x1156   :  { %1574 = vmatpush1.msra.mxu1 %v3061_v41 }
0x1157   :  { %1575 = vmatprep.subr.mxu1 %v3064_v42 }
0x1158   :  { %1576 = vmatpush1.msra.mxu1 %v3067_v43 }
0x1159   :  { %1825 = vmatprep.subr.mxu1 %v3070_v45 }
0x1209   :  { %v1347_v44 = vpop.f32.mrf.mxu1 }
0x120b   :  { %v1349_v46 = vpop.f32.mrf.mxu1 }
0x120c   :  { %v1354_v47 = vcombine.low %v1347_v44, %v1349_v46 }
0x120e   :  { %v1361_v48 = vrot.slane %v1354_v47, %v2823_v23 }
0x1210   :  { %v1368_v50 = vrot.slane %v1361_v48, %v2823_v23 }
0x1212   :  { %v1370_v51 = vadd.f32 %v1368_v50, %v1277_v49  ;;  %v1541_v49 = vld [vmem:[%s1540_s0] ss:$8 sm:$0x3] }
0x1214   :  { %v2377_v52 = vmul.f32 -1.442695, %v1370_v51  ;;  %v1378_v53 = vrot.slane %v1370_v51, 1 }
0x1216   :  { %2537 = vpow2.f32 %v2377_v52 }
0x1217   :  { %2539 = vtanh.f32 %v1378_v53 }
0x1223   :  { %v2538_v54 = vpop.eup %2537 }
0x1224   :  { %v1374_v55 = vadd.f32 1.0, %v2538_v54  ;;  %v2540_v56 = vpop.eup %2539 }
0x1226   :  { %2541 = vrcp.f32 %v1374_v55 }
0x1233   :  { %v2542_v57 = vpop.eup %2541 }
0x1234   :  { %1390 = vrot.lane.b32.xlu0 %v2542_v57, %s2693_s17  ;;  %v1382_v58 = vmul.f32 %v2542_v57, %v2540_v56  ;;  %v1381_v59 = vmul.f32 %v2542_v57, %v3017_v21 }
0x1236   :  { %1384 = vrot.lane.b32.xlu1 %v1382_v58, %s2693_s17 }
0x12a6   :  { %v1391_v63 = vpop.permute.xlu0 %1390 }
0x12a7   :  { %v1392_v17 = vrot.slane %v1391_v63, 1 }
0x12a8   :  { %v1385_v60 = vpop.permute.xlu1 %1384 }
0x12a9   :  { %v1387_v61 = vadd.f32 %v1385_v60, %v1381_v59 }
0x12ab   :  { %2543 = vtanh.f32 %v1387_v61 }
0x12b8   :  { %v2544_v62 = vpop.eup %2543 }
0x12b9   :  { %1395 = vrot.lane.b32.xlu1 %v2544_v62, %s2693_s17 }
0x132b   :  { %v1396_v18 = vpop.permute.xlu1 %1395 }
0x132c   :  { %v1398_v19 = vmul.f32 %v1396_v18, %v1392_v17 }
0x132e   :  { %v1399_v20 = vadd.f32 %v1398_v19, %v3021_v28  ;;  %2381 = vmatmul.mubr.msk.f32.vlgmr.msra.gmra.mxu0 %vm89_vm0, %v1398_v19 }
0x132f   :  { %1694 = vmatpush1.msra.mxu0 %v3024_v29  ;;  %1741 = vmatprep.mubr.f32.mxu0 %v2691_v0 }
0x1330   :  { %1695 = vmatprep.subr.mxu0 %v3028_v30 }
0x1331   :  { %1696 = vmatpush1.msra.mxu0 %v3031_v31 }
0x1332   :  { %1697 = vmatprep.subr.mxu0 %v3034_v32 }
0x1333   :  { %1698 = vmatpush1.msra.mxu0 %v3037_v33 }
0x1334   :  { %1699 = vmatprep.subr.mxu0 %v3040_v34 }
0x1335   :  { %1700 = vmatpush1.msra.mxu0 %v3043_v35 }
0x1336   :  { %1701 = vmatprep.subr.mxu0 %v3046_v36 }
0x1337   :  { %1702 = vmatpush1.msra.mxu0 %v3049_v37 }
0x1338   :  { %1703 = vmatprep.subr.mxu0 %v3052_v38 }
0x1339   :  { %1704 = vmatpush1.msra.mxu0 %v3055_v39 }
0x133a   :  { %1705 = vmatprep.subr.mxu0 %v3058_v40 }
0x133b   :  { %1706 = vmatpush1.msra.mxu0 %v3061_v41 }
0x133c   :  { %1707 = vmatprep.subr.mxu0 %v3064_v42 }
0x133d   :  { %1708 = vmatpush1.msra.mxu0 %v3067_v43 }
0x133e   :  { %1957 = vmatprep.subr.mxu0 %v3070_v45 }
0x13ee   :  { %v1479_v2 = vpop.f32.mrf.mxu0 }
0x13f0   :  { %v1481_v3 = vpop.f32.mrf.mxu0 }
0x13f1   :  { %v1486_v4 = vcombine.low %v1479_v2, %v1481_v3 }
0x13f3   :  { %v1493_v5 = vrot.slane %v1486_v4, %v2823_v23 }
0x13f5   :  { %v1500_v7 = vrot.slane %v1493_v5, %v2823_v23  ;;  %v1673_v5 = vld [vmem:[%s1672_s7] ss:$8 sm:$0x3] }
0x13f7   :  { %v1502_v8 = vadd.f32 %v1500_v7, %v1409_v6 }
0x13f9   :  { %v2382_v9 = vmul.f32 -1.442695, %v1502_v8  ;;  %v1510_v10 = vrot.slane %v1502_v8, 1 }
0x13fb   :  { %2545 = vpow2.f32 %v2382_v9 }
0x13fc   :  { %2547 = vtanh.f32 %v1510_v10 }
0x1408   :  { %v2546_v11 = vpop.eup %2545 }
0x1409   :  { %v1506_v1 = vadd.f32 1.0, %v2546_v11  ;;  %v2548_v12 = vpop.eup %2547 }
0x140b   :  { %2549 = vrcp.f32 %v1506_v1 }
0x1418   :  { %v2550_v13 = vpop.eup %2549 }
0x1419   :  { %1522 = vrot.lane.b32.xlu1 %v2550_v13, %s2693_s17  ;;  %v1514_v14 = vmul.f32 %v2550_v13, %v2548_v12  ;;  %v1513_v15 = vmul.f32 %v2550_v13, %v1387_v61 }
0x141b   :  { %1516 = vrot.lane.b32.xlu0 %v1514_v14, %s2693_s17 }
0x148b   :  { %v1523_v24 = vpop.permute.xlu1 %1522 }
0x148c   :  { %v1524_v25 = vrot.slane %v1523_v24, 1 }
0x148d   :  { %v1517_v16 = vpop.permute.xlu0 %1516 }
0x148e   :  { %v1519_v21 = vadd.f32 %v1517_v16, %v1513_v15 }
0x1490   :  { %2551 = vtanh.f32 %v1519_v21 }
0x149d   :  { %v2552_v22 = vpop.eup %2551 }
0x149e   :  { %1527 = vrot.lane.b32.xlu0 %v2552_v22, %s2693_s17 }
0x1510   :  { %v1528_v26 = vpop.permute.xlu0 %1527 }
0x1511   :  { %v1530_v27 = vmul.f32 %v1528_v26, %v1524_v25 }
0x1513   :  { %v1531_v28 = vadd.f32 %v1530_v27, %v1399_v20  ;;  %2386 = vmatmul.mubr.msk.f32.vlgmr.msra.gmra.mxu1 %vm89_vm0, %v1530_v27 }
0x1514   :  { %1826 = vmatpush1.msra.mxu1 %v3024_v29  ;;  %1873 = vmatprep.mubr.f32.mxu1 %v2691_v0 }
0x1515   :  { %1827 = vmatprep.subr.mxu1 %v3028_v30 }
0x1516   :  { %1828 = vmatpush1.msra.mxu1 %v3031_v31 }
0x1517   :  { %1829 = vmatprep.subr.mxu1 %v3034_v32 }
0x1518   :  { %1830 = vmatpush1.msra.mxu1 %v3037_v33 }
0x1519   :  { %1831 = vmatprep.subr.mxu1 %v3040_v34 }
0x151a   :  { %1832 = vmatpush1.msra.mxu1 %v3043_v35 }
0x151b   :  { %1833 = vmatprep.subr.mxu1 %v3046_v36 }
0x151c   :  { %1834 = vmatpush1.msra.mxu1 %v3049_v37 }
0x151d   :  { %1835 = vmatprep.subr.mxu1 %v3052_v38 }
0x151e   :  { %1836 = vmatpush1.msra.mxu1 %v3055_v39 }
0x151f   :  { %1837 = vmatprep.subr.mxu1 %v3058_v40 }
0x1520   :  { %1838 = vmatpush1.msra.mxu1 %v3061_v41 }
0x1521   :  { %1839 = vmatprep.subr.mxu1 %v3064_v42 }
0x1522   :  { %1840 = vmatpush1.msra.mxu1 %v3067_v43 }
0x1523   :  { %2089 = vmatprep.subr.mxu1 %v3070_v45 }
0x15d3   :  { %v1611_v44 = vpop.f32.mrf.mxu1 }
0x15d5   :  { %v1613_v46 = vpop.f32.mrf.mxu1 }
0x15d6   :  { %v1618_v47 = vcombine.low %v1611_v44, %v1613_v46 }
0x15d8   :  { %v1625_v48 = vrot.slane %v1618_v47, %v2823_v23 }
0x15da   :  { %v1632_v50 = vrot.slane %v1625_v48, %v2823_v23 }
0x15dc   :  { %v1634_v51 = vadd.f32 %v1632_v50, %v1541_v49 }
0x15de   :  { %v2387_v52 = vmul.f32 -1.442695, %v1634_v51  ;;  %v1642_v53 = vrot.slane %v1634_v51, 1 }
0x15e0   :  { %2553 = vpow2.f32 %v2387_v52 }
0x15e1   :  { %2555 = vtanh.f32 %v1642_v53 }
0x15ed   :  { %v2554_v54 = vpop.eup %2553 }
0x15ee   :  { %v1638_v45 = vadd.f32 1.0, %v2554_v54  ;;  %v2556_v55 = vpop.eup %2555 }
0x15f0   :  { %2557 = vrcp.f32 %v1638_v45 }
0x15fd   :  { %v2558_v56 = vpop.eup %2557 }
0x15fe   :  { %1654 = vrot.lane.b32.xlu0 %v2558_v56, %s2693_s17  ;;  %v1646_v57 = vmul.f32 %v2558_v56, %v2556_v55  ;;  %v1645_v58 = vmul.f32 %v2558_v56, %v1519_v21  ;;  %v1937_v55 = vld [vmem:[%s1936_s16] ss:$8 sm:$0x3] }
0x1600   :  { %1648 = vrot.lane.b32.xlu1 %v1646_v57, %s2693_s17 }
0x1670   :  { %v1655_v62 = vpop.permute.xlu0 %1654 }
0x1671   :  { %v1656_v63 = vrot.slane %v1655_v62, 1 }
0x1672   :  { %v1649_v59 = vpop.permute.xlu1 %1648 }
0x1673   :  { %v1651_v60 = vadd.f32 %v1649_v59, %v1645_v58 }
0x1675   :  { %2559 = vtanh.f32 %v1651_v60 }
0x1682   :  { %v2560_v61 = vpop.eup %2559 }
0x1683   :  { %1659 = vrot.lane.b32.xlu1 %v2560_v61, %s2693_s17 }
0x16f5   :  { %v1660_v17 = vpop.permute.xlu1 %1659 }
0x16f6   :  { %v1662_v18 = vmul.f32 %v1660_v17, %v1656_v63 }
0x16f8   :  { %v1663_v19 = vadd.f32 %v1662_v18, %v1531_v28  ;;  %2391 = vmatmul.mubr.msk.f32.vlgmr.msra.gmra.mxu0 %vm89_vm0, %v1662_v18 }
0x16f9   :  { %1958 = vmatpush1.msra.mxu0 %v3024_v29  ;;  %2005 = vmatprep.mubr.f32.mxu0 %v2691_v0 }
0x16fa   :  { %1959 = vmatprep.subr.mxu0 %v3028_v30 }
0x16fb   :  { %1960 = vmatpush1.msra.mxu0 %v3031_v31 }
0x16fc   :  { %1961 = vmatprep.subr.mxu0 %v3034_v32 }
0x16fd   :  { %1962 = vmatpush1.msra.mxu0 %v3037_v33 }
0x16fe   :  { %1963 = vmatprep.subr.mxu0 %v3040_v34 }
0x16ff   :  { %1964 = vmatpush1.msra.mxu0 %v3043_v35 }
0x1700   :  { %1965 = vmatprep.subr.mxu0 %v3046_v36 }
0x1701   :  { %1966 = vmatpush1.msra.mxu0 %v3049_v37 }
0x1702   :  { %1967 = vmatprep.subr.mxu0 %v3052_v38 }
0x1703   :  { %1968 = vmatpush1.msra.mxu0 %v3055_v39 }
0x1704   :  { %1969 = vmatprep.subr.mxu0 %v3058_v40 }
0x1705   :  { %1970 = vmatpush1.msra.mxu0 %v3061_v41 }
0x1706   :  { %1971 = vmatprep.subr.mxu0 %v3064_v42 }
0x1707   :  { %1972 = vmatpush1.msra.mxu0 %v3067_v43 }
0x1708   :  { %2434 = vmatprep.subr.mxu0 %v2691_v0 }
0x17b8   :  { %v1743_v20 = vpop.f32.mrf.mxu0 }
0x17ba   :  { %v1745_v2 = vpop.f32.mrf.mxu0 }
0x17bb   :  { %v1750_v3 = vcombine.low %v1743_v20, %v1745_v2 }
0x17bd   :  { %v1757_v4 = vrot.slane %v1750_v3, %v2823_v23 }
0x17bf   :  { %v1764_v6 = vrot.slane %v1757_v4, %v2823_v23 }
0x17c1   :  { %v1766_v7 = vadd.f32 %v1764_v6, %v1673_v5 }
0x17c3   :  { %v2392_v8 = vmul.f32 -1.442695, %v1766_v7  ;;  %v1774_v9 = vrot.slane %v1766_v7, 1 }
0x17c5   :  { %2561 = vpow2.f32 %v2392_v8 }
0x17c6   :  { %2563 = vtanh.f32 %v1774_v9 }
0x17d2   :  { %v2562_v10 = vpop.eup %2561 }
0x17d3   :  { %v1770_v11 = vadd.f32 1.0, %v2562_v10  ;;  %v2564_v1 = vpop.eup %2563 }
0x17d5   :  { %2565 = vrcp.f32 %v1770_v11 }
0x17e2   :  { %v2566_v12 = vpop.eup %2565 }
0x17e3   :  { %1786 = vrot.lane.b32.xlu1 %v2566_v12, %s2693_s17  ;;  %v1778_v13 = vmul.f32 %v2566_v12, %v2564_v1  ;;  %v1777_v14 = vmul.f32 %v2566_v12, %v1651_v60  ;;  %v2069_v1 = vld [vmem:[%s2068_s23] ss:$8 sm:$0x3] }
0x17e5   :  { %1780 = vrot.lane.b32.xlu0 %v1778_v13, %s2693_s17 }
0x1855   :  { %v1787_v22 = vpop.permute.xlu1 %1786 }
0x1856   :  { %v1788_v24 = vrot.slane %v1787_v22, 1 }
0x1857   :  { %v1781_v15 = vpop.permute.xlu0 %1780 }
0x1858   :  { %v1783_v16 = vadd.f32 %v1781_v15, %v1777_v14 }
0x185a   :  { %2567 = vtanh.f32 %v1783_v16 }
0x1867   :  { %v2568_v21 = vpop.eup %2567 }
0x1868   :  { %1791 = vrot.lane.b32.xlu0 %v2568_v21, %s2693_s17 }
0x18da   :  { %v1792_v25 = vpop.permute.xlu0 %1791 }
0x18db   :  { %v1794_v26 = vmul.f32 %v1792_v25, %v1788_v24 }
0x18dd   :  { %v1795_v27 = vadd.f32 %v1794_v26, %v1663_v19  ;;  %2396 = vmatmul.mubr.msk.f32.vlgmr.msra.gmra.mxu1 %vm89_vm0, %v1794_v26  ;;  %v2200_v26 = vld [vmem:[#allocation8 + $0x38] sm:$0xff] }
0x18de   :  { %2090 = vmatpush1.msra.mxu1 %v3024_v29  ;;  %2137 = vmatprep.mubr.f32.mxu1 %v2691_v0 }
0x18df   :  { %2091 = vmatprep.subr.mxu1 %v3028_v30 }
0x18e0   :  { %2092 = vmatpush1.msra.mxu1 %v3031_v31 }
0x18e1   :  { %2093 = vmatprep.subr.mxu1 %v3034_v32 }
0x18e2   :  { %2094 = vmatpush1.msra.mxu1 %v3037_v33  ;;  %v1805_v33 = vld [vmem:[%s1804_s12] ss:$8 sm:$0x3] }
0x18e3   :  { %2095 = vmatprep.subr.mxu1 %v3040_v34 }
0x18e4   :  { %2096 = vmatpush1.msra.mxu1 %v3043_v35 }
0x18e5   :  { %2097 = vmatprep.subr.mxu1 %v3046_v36 }
0x18e6   :  { %2098 = vmatpush1.msra.mxu1 %v3049_v37 }
0x18e7   :  { %2099 = vmatprep.subr.mxu1 %v3052_v38 }
0x18e8   :  { %2100 = vmatpush1.msra.mxu1 %v3055_v39 }
0x18e9   :  { %2101 = vmatprep.subr.mxu1 %v3058_v40 }
0x18ea   :  { %2102 = vmatpush1.msra.mxu1 %v3061_v41 }
0x18eb   :  { %2103 = vmatprep.subr.mxu1 %v3064_v42 }
0x18ec   :  { %2104 = vmatpush1.msra.mxu1 %v3067_v43 }
0x199d   :  { %v1875_v29 = vpop.f32.mrf.mxu1 }
0x199f   :  { %v1877_v30 = vpop.f32.mrf.mxu1 }
0x19a0   :  { %v1882_v31 = vcombine.low %v1875_v29, %v1877_v30  ;;  %v2197_v29 = vld [vmem:[#allocation8 + $0x20] sm:$0xff]  ;;  %v2196_v30 = vld [vmem:[#allocation8 + $0x18] sm:$0xff] }
0x19a2   :  { %v1889_v32 = vrot.slane %v1882_v31, %v2823_v23 }
0x19a4   :  { %v1896_v34 = vrot.slane %v1889_v32, %v2823_v23 }
0x19a6   :  { %v1898_v35 = vadd.f32 %v1896_v34, %v1805_v33  ;;  %v2195_v34 = vld [vmem:[#allocation8 + $0x10] sm:$0xff] }
0x19a8   :  { %v2397_v36 = vmul.f32 -1.442695, %v1898_v35  ;;  %v1906_v37 = vrot.slane %v1898_v35, 1  ;;  %v2194_v35 = vld [vmem:[#allocation8 + $0x8] sm:$0xff] }
0x19aa   :  { %2569 = vpow2.f32 %v2397_v36  ;;  %v2193_v36 = vld [vmem:[#allocation8] sm:$0xff] }
0x19ab   :  { %2571 = vtanh.f32 %v1906_v37 }
0x19b7   :  { %v2570_v38 = vpop.eup %2569 }
0x19b8   :  { %v1902_v39 = vadd.f32 1.0, %v2570_v38  ;;  %v2572_v40 = vpop.eup %2571 }
0x19ba   :  { %2573 = vrcp.f32 %v1902_v39 }
0x19c7   :  { %v2574_v41 = vpop.eup %2573 }
0x19c8   :  { %1918 = vrot.lane.b32.xlu0 %v2574_v41, %s2693_s17  ;;  %v1910_v42 = vmul.f32 %v2574_v41, %v2572_v40  ;;  %v1909_v43 = vmul.f32 %v2574_v41, %v1783_v16 }
0x19ca   :  { %1912 = vrot.lane.b32.xlu1 %v1910_v42, %s2693_s17 }
0x1a3a   :  { %v1919_v47 = vpop.permute.xlu0 %1918 }
0x1a3b   :  { %v1920_v48 = vrot.slane %v1919_v47, 1 }
0x1a3c   :  { %v1913_v28 = vpop.permute.xlu1 %1912 }
0x1a3d   :  { %v1915_v44 = vadd.f32 %v1913_v28, %v1909_v43  ;;  %v2201_v28 = vld [vmem:[%s3202_s4] sm:$0x1] }
0x1a3f   :  { %2575 = vtanh.f32 %v1915_v44 }
0x1a4c   :  { %v2576_v46 = vpop.eup %2575 }
0x1a4d   :  { %1923 = vrot.lane.b32.xlu1 %v2576_v46, %s2693_s17 }
0x1abf   :  { %v1924_v49 = vpop.permute.xlu1 %1923 }
0x1ac0   :  { %v1926_v50 = vmul.f32 %v1924_v49, %v1920_v48 }
0x1ac2   :  { %v1927_v51 = vadd.f32 %v1926_v50, %v1795_v27  ;;  %2401 = vmatmul.mubr.msk.f32.vlgmr.msra.gmra.mxu0 %vm89_vm0, %v1926_v50  ;;  %v2199_v27 = vld [vmem:[#allocation8 + $0x30] sm:$0xff] }
0x1ac3   :  { %2435 = vmatpush3.msra.mxu0 %v2200_v26  ;;  %2450 = vmatprep.mubr.msk.f32.mxu0 %vm2694_vm1, %v2691_v0 }
0x1ac4   :  { %2436 = vmatprep.subr.mxu0 %v2691_v0 }
0x1ac5   :  { %2437 = vmatpush3.msra.mxu0 %v2199_v27 }
0x1ac6   :  { %2438 = vmatprep.subr.mxu0 %v2691_v0 }
0x1b82   :  { %v2007_v52 = vpop.f32.mrf.mxu0 }
0x1b84   :  { %v2009_v53 = vpop.f32.mrf.mxu0 }
0x1b85   :  { %v2014_v54 = vcombine.low %v2007_v52, %v2009_v53 }
0x1b87   :  { %v2021_v45 = vrot.slane %v2014_v54, %v2823_v23 }
0x1b89   :  { %v2028_v56 = vrot.slane %v2021_v45, %v2823_v23 }
0x1b8b   :  { %v2030_v57 = vadd.f32 %v2028_v56, %v1937_v55 }
0x1b8d   :  { %v2402_v58 = vmul.f32 -1.442695, %v2030_v57  ;;  %v2038_v59 = vrot.slane %v2030_v57, 1 }
0x1b8f   :  { %2577 = vpow2.f32 %v2402_v58 }
0x1b90   :  { %2579 = vtanh.f32 %v2038_v59 }
0x1b9c   :  { %v2578_v60 = vpop.eup %2577 }
0x1b9d   :  { %v2034_v61 = vadd.f32 1.0, %v2578_v60  ;;  %v2580_v62 = vpop.eup %2579 }
0x1b9f   :  { %2581 = vrcp.f32 %v2034_v61 }
0x1bac   :  { %v2582_v63 = vpop.eup %2581 }
0x1bad   :  { %2050 = vrot.lane.b32.xlu1 %v2582_v63, %s2693_s17  ;;  %v2042_v17 = vmul.f32 %v2582_v63, %v2580_v62  ;;  %v2041_v18 = vmul.f32 %v2582_v63, %v1915_v44 }
0x1baf   :  { %2044 = vrot.lane.b32.xlu0 %v2042_v17, %s2693_s17 }
0x1c1f   :  { %v2051_v3 = vpop.permute.xlu1 %2050 }
0x1c20   :  { %v2052_v4 = vrot.slane %v2051_v3, 1 }
0x1c21   :  { %v2045_v19 = vpop.permute.xlu0 %2044 }
0x1c22   :  { %v2047_v20 = vadd.f32 %v2045_v19, %v2041_v18 }
0x1c24   :  { %2583 = vtanh.f32 %v2047_v20 }
0x1c31   :  { %v2584_v2 = vpop.eup %2583 }
0x1c32   :  { %2055 = vrot.lane.b32.xlu0 %v2584_v2, %s2693_s17 }
0x1ca4   :  { %v2056_v5 = vpop.permute.xlu0 %2055 }
0x1ca5   :  { %v2058_v6 = vmul.f32 %v2056_v5, %v2052_v4 }
0x1ca7   :  { %v2059_v7 = vadd.f32 %v2058_v6, %v1927_v51  ;;  %2406 = vmatmul.mubr.msk.f32.vlgmr.msra.gmra.mxu1 %vm89_vm0, %v2058_v6 }
0x1d67   :  { %v2139_v8 = vpop.f32.mrf.mxu1 }
0x1d69   :  { %v2141_v9 = vpop.f32.mrf.mxu1 }
0x1d6a   :  { %v2146_v10 = vcombine.low %v2139_v8, %v2141_v9 }
0x1d6c   :  { %v2153_v11 = vrot.slane %v2146_v10, %v2823_v23 }
0x1d6e   :  { %v2160_v12 = vrot.slane %v2153_v11, %v2823_v23  ;;  %v2198_v23 = vld [vmem:[#allocation8 + $0x28] sm:$0xff] }
0x1d6f   :  { %2439 = vmatpush3.msra.mxu0 %v2198_v23 }
0x1d70   :  { %v2162_v13 = vadd.f32 %v2160_v12, %v2069_v1  ;;  %2440 = vmatprep.subr.mxu0 %v2691_v0 }
0x1d71   :  { %2441 = vmatpush3.msra.mxu0 %v2197_v29 }
0x1d72   :  { %v2407_v14 = vmul.f32 -1.442695, %v2162_v13  ;;  %v2170_v15 = vrot.slane %v2162_v13, 1  ;;  %2442 = vmatprep.subr.mxu0 %v2691_v0 }
0x1d73   :  { %2443 = vmatpush3.msra.mxu0 %v2196_v30 }
0x1d74   :  { %2585 = vpow2.f32 %v2407_v14  ;;  %2444 = vmatprep.subr.mxu0 %v2691_v0 }
0x1d75   :  { %2587 = vtanh.f32 %v2170_v15  ;;  %2445 = vmatpush3.msra.mxu0 %v2195_v34 }
0x1d76   :  { %2446 = vmatprep.subr.mxu0 %v2691_v0 }
0x1d77   :  { %2447 = vmatpush3.msra.mxu0 %v2194_v35 }
0x1d78   :  { %2448 = vmatprep.subr.mxu0 %v2691_v0 }
0x1d79   :  { %2449 = vmatpush3.msra.mxu0 %v2193_v36 }
0x1d81   :  { %v2586_v16 = vpop.eup %2585 }
0x1d82   :  { %v2166_v21 = vadd.f32 1.0, %v2586_v16  ;;  %v2588_v22 = vpop.eup %2587 }
0x1d84   :  { %2589 = vrcp.f32 %v2166_v21 }
0x1d91   :  { %v2590_v24 = vpop.eup %2589 }
0x1d92   :  { %2182 = vrot.lane.b32.xlu0 %v2590_v24, %s2693_s17  ;;  %v2174_v25 = vmul.f32 %v2590_v24, %v2588_v22  ;;  %v2173_v31 = vmul.f32 %v2590_v24, %v2047_v20 }
0x1d94   :  { %2176 = vrot.lane.b32.xlu1 %v2174_v25, %s2693_s17 }
0x1e04   :  { %v2183_v38 = vpop.permute.xlu0 %2182 }
0x1e05   :  { %v2184_v39 = vrot.slane %v2183_v38, 1 }
0x1e06   :  { %v2177_v32 = vpop.permute.xlu1 %2176 }
0x1e07   :  { %v2179_v33 = vadd.f32 %v2177_v32, %v2173_v31 }
0x1e09   :  { %2591 = vtanh.f32 %v2179_v33 }
0x1e16   :  { %v2592_v37 = vpop.eup %2591 }
0x1e17   :  { %2187 = vrot.lane.b32.xlu1 %v2592_v37, %s2693_s17 }
0x1e89   :  { %v2188_v40 = vpop.permute.xlu1 %2187 }
0x1e8a   :  { %v2190_v41 = vmul.f32 %v2188_v40, %v2184_v39 }
0x1e8c   :  { %v2191_v42 = vadd.f32 %v2190_v41, %v2059_v7 }
0x1e8e   :  { %v2192_v43 = vmul.f32 0.0625, %v2191_v42 }
0x1e90   :  { %2451 = vmatmul.mubr.msk.f32.vlgmr.msra.gmra.mxu0 %vm89_vm0, %v2192_v43 }
0x1f50   :  { %v2271_v44 = vpop.f32.mrf.mxu0 }
0x1f51   :  { %v2272_v46 = vadd.f32 %v2271_v44, %v2201_v28 }
0x1f52   :  { %v2452_v47 = vpop.f32.mrf.mxu0 }
0x1f53   :  { %2275 = vst [vmem:[%s3203_s5] sm:$0x1] %v2272_v46 }
0x1f54   :  { %2280 = vsyncpa [#allocation5], 1 }
0x1f55   :  { %2281 = vsyncpa [#allocation7], 1 }

</bundles_post_ra>
